<compile_context>
chip_gen: v7x
topology: tpu7x:2x2x1
jax: 0.10.0
libtpu: 0.0.40
codegen_flags: <defaults>
</compile_context>

<pallas_src>
import functools

import jax
import jax.numpy as jnp
from jax import lax
from jax.experimental import pallas as pl
from jax.experimental.pallas import tpu as pltpu


def _varqec_kernel(er_ref, ei_ref, w_ref, qs_ref, out_ref, *,
                   num_logical_dim, num_code_rows, block_errors):
    """One grid step = one block of `block_errors` error operators.

    er_ref : (B, N, N)    Re(E) block
    ei_ref : (B, N, N)    Im(E) block
    w_ref  : (2, N, 2Dp)  weight-stationary RHS: [0]=[Qr^T|Qi^T], [1]=[-Qi^T|Qr^T]
    qs_ref : (2Dp, N)     stacked codewords [[Qr],[Qi]]
    out_ref: (8, 128)     per-block partial loss, broadcast lane-dense
    """
    N = qs_ref.shape[1]
    Dp = num_code_rows
    L = num_logical_dim
    B = block_errors
    f32 = jnp.float32

    # ---- Stage 1: stream the error block as a tall LHS (M = B*N, K = N) against the
    # tiny constant RHS. Y = E @ Q^T (complex) laid out as [Yr | Yi], shape (B*N, 2Dp).
    er = er_ref[...].reshape(B * N, N)                      # free leading-dim merge
    ei = ei_ref[...].reshape(B * N, N)
    wr = w_ref[0]                                           # (N, 2Dp) = [Qr^T | Qi^T]
    wi = w_ref[1]                                           # (N, 2Dp) = [-Qi^T | Qr^T]
    y = (jnp.dot(er, wr, preferred_element_type=f32)
         + jnp.dot(ei, wi, preferred_element_type=f32))     # (B*N, 2Dp)

    qs = qs_ref[...]                                        # (2Dp, N) = [[Qr],[Qi]]

    # ---- Stage 2: per-error small matmul P_e = Qs @ Y_e (MXU cost ~B*2 pushes, tiny).
    # IP = conj(Q) @ Y = (Qr Yr + Qi Yi) + i (Qr Yi - Qi Yr)
    ipr_list = []
    ipi_list = []
    for e in range(B):
        y_e = y[e * N:(e + 1) * N, :]                       # (N, 2Dp) static view
        p = jnp.dot(qs, y_e, preferred_element_type=f32)    # (2Dp, 2Dp)
        ipr_list.append(p[:Dp, :Dp] + p[Dp:, Dp:])
        ipi_list.append(p[:Dp, Dp:] - p[Dp:, :Dp])
    ipr = jnp.stack(ipr_list, axis=0)                       # (B, Dp, Dp)
    ipi = jnp.stack(ipi_list, axis=0)

    # ---- Batched L2 Knill-Laflamme epilogue over the whole block ----
    row = lax.broadcasted_iota(jnp.int32, (1, Dp, Dp), 1)
    col = lax.broadcasted_iota(jnp.int32, (1, Dp, Dp), 2)
    in_block = (row < L) & (col < L)
    upper_mask = (col > row) & in_block                     # strict upper triangle, LxL
    diag_mask = (row == col) & in_block                     # first L diagonal entries

    absq = ipr * ipr + ipi * ipi
    tmp0 = jnp.sum(jnp.where(upper_mask, absq, 0.0))

    dr = jnp.sum(jnp.where(diag_mask, ipr, 0.0), axis=2)    # (B, Dp)
    di = jnp.sum(jnp.where(diag_mask, ipi, 0.0), axis=2)
    mean_r = jnp.sum(dr, axis=1, keepdims=True) / L         # (B, 1)
    mean_i = jnp.sum(di, axis=1, keepdims=True) / L
    valid = lax.broadcasted_iota(jnp.int32, (1, Dp), 1) < L
    dev_r = jnp.where(valid, dr - mean_r, 0.0)
    dev_i = jnp.where(valid, di - mean_i, 0.0)
    tmp2 = jnp.sum(dev_r * dev_r + dev_i * dev_i)

    total = tmp0 + tmp2
    # single lane-dense store per grid step
    out_ref[...] = jnp.broadcast_to(total, out_ref.shape).astype(out_ref.dtype)


def _choose_block_errors(num_error, N, max_block=8, vmem_budget_bytes=16 << 20):
    """Pick a block size that divides num_error (no padded work), fits a VMEM budget
    (double-buffered re+im f32 tiles), and prefers an even block count (v7x 2 TCs)."""
    per_err_bytes = 2 * 2 * N * N * 4                        # 2 planes x 2 buffers x f32
    cap = max(1, min(max_block, vmem_budget_bytes // per_err_bytes, num_error))
    divisors = [b for b in range(1, cap + 1) if num_error % b == 0]
    even_blocks = [b for b in divisors if (num_error // b) % 2 == 0]
    return max(even_blocks) if even_blocks else max(divisors)


def varqec_loss(err_re, err_im, q_re, q_im, num_logical_dim, *, max_block_errors=8):
    """sum_e KL-loss(conj(q0) @ E_e @ q0^T), L2 flavor, via a blocked Pallas kernel."""
    num_error, N, _ = err_re.shape
    Dp = q_re.shape[0]

    block_errors = _choose_block_errors(num_error, N, max_block_errors)
    num_blocks = num_error // block_errors

    err_re = err_re.astype(jnp.float32)
    err_im = err_im.astype(jnp.float32)
    q_re = q_re.astype(jnp.float32)
    q_im = q_im.astype(jnp.float32)

    # Weight-stationary stage-1 RHS:
    #   [Yr|Yi] = Er @ [Qr^T|Qi^T] + Ei @ [-Qi^T|Qr^T]
    w = jnp.stack([
        jnp.concatenate([q_re.T, q_im.T], axis=1),
        jnp.concatenate([-q_im.T, q_re.T], axis=1),
    ], axis=0)                                               # (2, N, 2Dp), tiny
    qs = jnp.concatenate([q_re, q_im], axis=0)               # (2Dp, N), tiny

    kernel = functools.partial(
        _varqec_kernel,
        num_logical_dim=num_logical_dim,
        num_code_rows=Dp,
        block_errors=block_errors,
    )

    # VMEM: double-buffered re+im error tiles dominate; set the limit explicitly so the
    # same code stays within v7x's smaller physical VMEM if N grows.
    block_in_bytes = 2 * 2 * block_errors * N * N * 4
    vmem_limit = int(min(max(3 * block_in_bytes + (1 << 20), 16 << 20), 32 << 20))

    flops = num_error * (2 * 2 * N * N * (2 * Dp)            # stage-1 dots
                         + 2 * (2 * Dp) * N * (2 * Dp))      # stage-2 dots
    bytes_accessed = (2 * num_error * N * N                  # error planes
                      + 2 * N * 2 * Dp + 2 * Dp * N          # W, Qs
                      + num_blocks * 8 * 128) * 4
    cost = pl.CostEstimate(flops=flops, transcendentals=0, bytes_accessed=bytes_accessed)

    out = pl.pallas_call(
        kernel,
        out_shape=jax.ShapeDtypeStruct((num_blocks, 8, 128), jnp.float32),
        grid_spec=pltpu.PrefetchScalarGridSpec(
            num_scalar_prefetch=0,
            grid=(num_blocks,),
            in_specs=[
                pl.BlockSpec((block_errors, N, N), lambda b: (b, 0, 0)),   # Re(E) block
                pl.BlockSpec((block_errors, N, N), lambda b: (b, 0, 0)),   # Im(E) block
                pl.BlockSpec((2, N, 2 * Dp), lambda b: (0, 0, 0)),         # W (resident)
                pl.BlockSpec((2 * Dp, N), lambda b: (0, 0)),               # Qs (resident)
            ],
            out_specs=pl.BlockSpec((None, 8, 128), lambda b: (b, 0, 0)),   # per-block partial
        ),
        compiler_params=pltpu.CompilerParams(
            dimension_semantics=("parallel",),
            vmem_limit_bytes=vmem_limit,
        ),
        cost_estimate=cost,
    )(err_re, err_im, w, qs)

    # Each block broadcast its partial across its (8,128) tile; reduce the partials here.
    return jnp.sum(out[:, 0, 0])


def reference_loss(q_c, errs_c, num_logical_dim):
    """Plain-JAX replica of knill_laflamme_loss(inner_product[:, :L, :L], 'L2')."""
    L = num_logical_dim
    q = q_c[:L]
    ip = jnp.einsum("aj,ejk,bk->eab", q.conj(), errs_c, q)
    mask = jnp.triu(jnp.ones((L, L), dtype=ip.dtype), k=1)
    tmp0 = jnp.sum(jnp.abs(ip * mask) ** 2)
    diag = jnp.diagonal(ip, axis1=1, axis2=2)
    tmp2 = jnp.sum(jnp.abs(diag - diag.mean(axis=1, keepdims=True)) ** 2)
    return (tmp0 + tmp2).real


if __name__ == "__main__":
    # small but TPU-friendly shapes implied by the module:
    #   num_qubit = 7            -> Hilbert dim N = 128
    #   num_logical_dim = 4      -> num_logical_qubit = 2 (padded to 8 rows)
    #   num_error = 6            -> block_errors = 3, two balanced blocks
    num_qubit = 7
    N = 2 ** num_qubit
    num_logical_dim = 4
    D_pad = 8
    num_error = 6

    key = jax.random.PRNGKey(0)
    k_qr, k_qi, k_er, k_ei = jax.random.split(key, 4)

    # synthetic "_run_circuit" output: deterministic normalized complex code words
    q_re_l = jax.random.normal(k_qr, (num_logical_dim, N), dtype=jnp.float32)
    q_im_l = jax.random.normal(k_qi, (num_logical_dim, N), dtype=jnp.float32)
    norm = jnp.sqrt(jnp.sum(q_re_l * q_re_l + q_im_l * q_im_l, axis=1, keepdims=True))
    q_re_l = q_re_l / norm
    q_im_l = q_im_l / norm
    # zero-pad codeword axis to a sublane-friendly 8 rows (padding does not affect loss)
    q_re = jnp.zeros((D_pad, N), dtype=jnp.float32).at[:num_logical_dim].set(q_re_l)
    q_im = jnp.zeros((D_pad, N), dtype=jnp.float32).at[:num_logical_dim].set(q_im_l)

    # synthetic error_list as dense complex operators
    err_re = jax.random.normal(k_er, (num_error, N, N), dtype=jnp.float32) * 0.1
    err_im = jax.random.normal(k_ei, (num_error, N, N), dtype=jnp.float32) * 0.1

    loss = varqec_loss(err_re, err_im, q_re, q_im, num_logical_dim)
    loss = jax.block_until_ready(loss)

    # correctness check against a plain-JAX complex reference
    q_c = (q_re + 1j * q_im).astype(jnp.complex64)
    errs_c = (err_re + 1j * err_im).astype(jnp.complex64)
    ref = jax.block_until_ready(reference_loss(q_c, errs_c, num_logical_dim))

    assert jnp.allclose(loss, ref, rtol=1e-3, atol=1e-4), (loss, ref)
    print("KERNEL_OK")
</pallas_src>

<mosaic_0001>
module attributes {stable_mosaic.version = 11 : i64} {
  func.func @_varqec_kernel(%arg0: i32, %arg1: memref<3x128x128xf32, #tpu.memory_space<vmem>>, %arg2: memref<3x128x128xf32, #tpu.memory_space<vmem>>, %arg3: memref<2x128x16xf32, #tpu.memory_space<vmem>>, %arg4: memref<16x128xf32, #tpu.memory_space<vmem>>, %arg5: memref<1x8x128xf32, #tpu.memory_space<vmem>>) attributes {dimension_semantics = [#tpu.dimension_semantics<parallel>], iteration_bounds = array<i64: 2>, scalar_prefetch = 0 : i64, scratch_operands = 0 : i64, tpu.core_type = #tpu.core_type<tc>, window_params = [{transform_indices = @transform_0, window_bounds = array<i64: 3, 128, 128>}, {transform_indices = @transform_1, window_bounds = array<i64: 3, 128, 128>}, {pipeline_mode = #tpu.pipeline_mode<synchronous>, transform_indices = @transform_2, window_bounds = array<i64: 2, 128, 16>}, {pipeline_mode = #tpu.pipeline_mode<synchronous>, transform_indices = @transform_3, window_bounds = array<i64: 16, 128>}, {transform_indices = @transform_4, window_bounds = array<i64: 1, 8, 128>}]} {
    %c0 = arith.constant 0 : index
    %c0_0 = arith.constant 0 : index
    %c0_1 = arith.constant 0 : index
    %0 = vector.load %arg1[%c0, %c0_0, %c0_1] : memref<3x128x128xf32, #tpu.memory_space<vmem>>, vector<3x128x128xf32>
    %1 = vector.shape_cast %0 : vector<3x128x128xf32> to vector<384x128xf32>
    %c0_2 = arith.constant 0 : index
    %c0_3 = arith.constant 0 : index
    %c0_4 = arith.constant 0 : index
    %2 = vector.load %arg2[%c0_2, %c0_3, %c0_4] : memref<3x128x128xf32, #tpu.memory_space<vmem>>, vector<3x128x128xf32>
    %3 = vector.shape_cast %2 : vector<3x128x128xf32> to vector<384x128xf32>
    %c0_5 = arith.constant 0 : index
    %c0_6 = arith.constant 0 : index
    %c0_7 = arith.constant 0 : index
    %4 = vector.load %arg3[%c0_5, %c0_6, %c0_7] : memref<2x128x16xf32, #tpu.memory_space<vmem>>, vector<1x128x16xf32>
    %5 = vector.shape_cast %4 : vector<1x128x16xf32> to vector<128x16xf32>
    %c1 = arith.constant 1 : index
    %c0_8 = arith.constant 0 : index
    %c0_9 = arith.constant 0 : index
    %6 = vector.load %arg3[%c1, %c0_8, %c0_9] : memref<2x128x16xf32, #tpu.memory_space<vmem>>, vector<1x128x16xf32>
    %7 = vector.shape_cast %6 : vector<1x128x16xf32> to vector<128x16xf32>
    %cst = arith.constant dense<0.000000e+00> : vector<384x16xf32>
    %8 = tpu.matmul %1, %5, %cst {dimension_numbers = #tpu.dot_dimension_numbers<[1], [0], [0], [1], [0, 0, 1, 1], [], []>} : vector<384x128xf32>, vector<128x16xf32>, vector<384x16xf32> -> vector<384x16xf32>
    %cst_10 = arith.constant dense<0.000000e+00> : vector<384x16xf32>
    %9 = tpu.matmul %3, %7, %cst_10 {dimension_numbers = #tpu.dot_dimension_numbers<[1], [0], [0], [1], [0, 0, 1, 1], [], []>} : vector<384x128xf32>, vector<128x16xf32>, vector<384x16xf32> -> vector<384x16xf32>
    %10 = arith.addf %8, %9 : vector<384x16xf32>
    %c0_11 = arith.constant 0 : index
    %c0_12 = arith.constant 0 : index
    %11 = vector.load %arg4[%c0_11, %c0_12] : memref<16x128xf32, #tpu.memory_space<vmem>>, vector<16x128xf32>
    %12 = vector.extract_strided_slice %10 {offsets = [0, 0], sizes = [128, 16], strides = [1, 1]} : vector<384x16xf32> to vector<128x16xf32>
    %cst_13 = arith.constant dense<0.000000e+00> : vector<16x16xf32>
    %13 = tpu.matmul %11, %12, %cst_13 {dimension_numbers = #tpu.dot_dimension_numbers<[1], [0], [0], [1], [0, 0, 1, 1], [], []>} : vector<16x128xf32>, vector<128x16xf32>, vector<16x16xf32> -> vector<16x16xf32>
    %14 = vector.extract_strided_slice %13 {offsets = [0, 0], sizes = [8, 8], strides = [1, 1]} : vector<16x16xf32> to vector<8x8xf32>
    %15 = vector.extract_strided_slice %13 {offsets = [8, 8], sizes = [8, 8], strides = [1, 1]} : vector<16x16xf32> to vector<8x8xf32>
    %16 = arith.addf %14, %15 : vector<8x8xf32>
    %17 = vector.extract_strided_slice %13 {offsets = [0, 8], sizes = [8, 8], strides = [1, 1]} : vector<16x16xf32> to vector<8x8xf32>
    %18 = vector.extract_strided_slice %13 {offsets = [8, 0], sizes = [8, 8], strides = [1, 1]} : vector<16x16xf32> to vector<8x8xf32>
    %19 = arith.subf %17, %18 : vector<8x8xf32>
    %20 = vector.extract_strided_slice %10 {offsets = [128, 0], sizes = [128, 16], strides = [1, 1]} : vector<384x16xf32> to vector<128x16xf32>
    %cst_14 = arith.constant dense<0.000000e+00> : vector<16x16xf32>
    %21 = tpu.matmul %11, %20, %cst_14 {dimension_numbers = #tpu.dot_dimension_numbers<[1], [0], [0], [1], [0, 0, 1, 1], [], []>} : vector<16x128xf32>, vector<128x16xf32>, vector<16x16xf32> -> vector<16x16xf32>
    %22 = vector.extract_strided_slice %21 {offsets = [0, 0], sizes = [8, 8], strides = [1, 1]} : vector<16x16xf32> to vector<8x8xf32>
    %23 = vector.extract_strided_slice %21 {offsets = [8, 8], sizes = [8, 8], strides = [1, 1]} : vector<16x16xf32> to vector<8x8xf32>
    %24 = arith.addf %22, %23 : vector<8x8xf32>
    %25 = vector.extract_strided_slice %21 {offsets = [0, 8], sizes = [8, 8], strides = [1, 1]} : vector<16x16xf32> to vector<8x8xf32>
    %26 = vector.extract_strided_slice %21 {offsets = [8, 0], sizes = [8, 8], strides = [1, 1]} : vector<16x16xf32> to vector<8x8xf32>
    %27 = arith.subf %25, %26 : vector<8x8xf32>
    %28 = vector.extract_strided_slice %10 {offsets = [256, 0], sizes = [128, 16], strides = [1, 1]} : vector<384x16xf32> to vector<128x16xf32>
    %cst_15 = arith.constant dense<0.000000e+00> : vector<16x16xf32>
    %29 = tpu.matmul %11, %28, %cst_15 {dimension_numbers = #tpu.dot_dimension_numbers<[1], [0], [0], [1], [0, 0, 1, 1], [], []>} : vector<16x128xf32>, vector<128x16xf32>, vector<16x16xf32> -> vector<16x16xf32>
    %30 = vector.extract_strided_slice %29 {offsets = [0, 0], sizes = [8, 8], strides = [1, 1]} : vector<16x16xf32> to vector<8x8xf32>
    %31 = vector.extract_strided_slice %29 {offsets = [8, 8], sizes = [8, 8], strides = [1, 1]} : vector<16x16xf32> to vector<8x8xf32>
    %32 = arith.addf %30, %31 : vector<8x8xf32>
    %33 = vector.extract_strided_slice %29 {offsets = [0, 8], sizes = [8, 8], strides = [1, 1]} : vector<16x16xf32> to vector<8x8xf32>
    %34 = vector.extract_strided_slice %29 {offsets = [8, 0], sizes = [8, 8], strides = [1, 1]} : vector<16x16xf32> to vector<8x8xf32>
    %35 = arith.subf %33, %34 : vector<8x8xf32>
    %36 = vector.shape_cast %16 : vector<8x8xf32> to vector<1x8x8xf32>
    %37 = vector.shape_cast %24 : vector<8x8xf32> to vector<1x8x8xf32>
    %38 = vector.shape_cast %32 : vector<8x8xf32> to vector<1x8x8xf32>
    %39 = tpu.concatenate %36, %37, %38 in 0 : vector<1x8x8xf32>, vector<1x8x8xf32>, vector<1x8x8xf32> -> vector<3x8x8xf32>
    %40 = vector.shape_cast %19 : vector<8x8xf32> to vector<1x8x8xf32>
    %41 = vector.shape_cast %27 : vector<8x8xf32> to vector<1x8x8xf32>
    %42 = vector.shape_cast %35 : vector<8x8xf32> to vector<1x8x8xf32>
    %43 = tpu.concatenate %40, %41, %42 in 0 : vector<1x8x8xf32>, vector<1x8x8xf32>, vector<1x8x8xf32> -> vector<3x8x8xf32>
    %44 = tpu.iota {dimensions = array<i32: 1>} : vector<1x8x8xi32>
    %45 = tpu.iota {dimensions = array<i32: 2>} : vector<1x8x8xi32>
    %c4_i32 = arith.constant 4 : i32
    %46 = vector.broadcast %c4_i32 : i32 to vector<1x8x8xi32>
    %47 = arith.cmpi slt, %44, %46 : vector<1x8x8xi32>
    %c4_i32_16 = arith.constant 4 : i32
    %48 = vector.broadcast %c4_i32_16 : i32 to vector<1x8x8xi32>
    %49 = arith.cmpi slt, %45, %48 : vector<1x8x8xi32>
    %50 = arith.andi %47, %49 : vector<1x8x8xi1>
    %51 = arith.cmpi sgt, %45, %44 : vector<1x8x8xi32>
    %52 = arith.andi %51, %50 : vector<1x8x8xi1>
    %53 = arith.cmpi eq, %44, %45 : vector<1x8x8xi32>
    %54 = arith.andi %53, %50 : vector<1x8x8xi1>
    %55 = arith.mulf %39, %39 : vector<3x8x8xf32>
    %56 = arith.mulf %43, %43 : vector<3x8x8xf32>
    %57 = arith.addf %55, %56 : vector<3x8x8xf32>
    %cst_17 = arith.constant 0.000000e+00 : f32
    %58 = vector.shape_cast %52 : vector<1x8x8xi1> to vector<1x8x8xi1>
    %59 = vector.broadcast %58 : vector<1x8x8xi1> to vector<3x8x8xi1>
    %60 = vector.broadcast %cst_17 : f32 to vector<3x8x8xf32>
    %61 = arith.select %59, %57, %60 : vector<3x8x8xi1>, vector<3x8x8xf32>
    %62 = vector.shape_cast %61 : vector<3x8x8xf32> to vector<1x3x8x8xf32>
    %cst_18 = arith.constant dense<0.000000e+00> : vector<1xf32>
    %63 = vector.multi_reduction <add>, %62, %cst_18 [1, 2, 3] : vector<1x3x8x8xf32> to vector<1xf32>
    %64 = vector.shape_cast %63 : vector<1xf32> to vector<1x1x1x1xf32>
    %65 = vector.extract %64[0, 0, 0, 0] : f32 from vector<1x1x1x1xf32>
    %cst_19 = arith.constant 0.000000e+00 : f32
    %66 = vector.shape_cast %54 : vector<1x8x8xi1> to vector<1x8x8xi1>
    %67 = vector.broadcast %66 : vector<1x8x8xi1> to vector<3x8x8xi1>
    %68 = vector.broadcast %cst_19 : f32 to vector<3x8x8xf32>
    %69 = arith.select %67, %39, %68 : vector<3x8x8xi1>, vector<3x8x8xf32>
    %cst_20 = arith.constant dense<0.000000e+00> : vector<3x8xf32>
    %70 = vector.multi_reduction <add>, %69, %cst_20 [2] : vector<3x8x8xf32> to vector<3x8xf32>
    %cst_21 = arith.constant 0.000000e+00 : f32
    %71 = vector.shape_cast %54 : vector<1x8x8xi1> to vector<1x8x8xi1>
    %72 = vector.broadcast %71 : vector<1x8x8xi1> to vector<3x8x8xi1>
    %73 = vector.broadcast %cst_21 : f32 to vector<3x8x8xf32>
    %74 = arith.select %72, %43, %73 : vector<3x8x8xi1>, vector<3x8x8xf32>
    %cst_22 = arith.constant dense<0.000000e+00> : vector<3x8xf32>
    %75 = vector.multi_reduction <add>, %74, %cst_22 [2] : vector<3x8x8xf32> to vector<3x8xf32>
    %cst_23 = arith.constant dense<0.000000e+00> : vector<3xf32>
    %76 = vector.multi_reduction <add>, %70, %cst_23 [1] : vector<3x8xf32> to vector<3xf32>
    %77 = vector.shape_cast %76 : vector<3xf32> to vector<3x1xf32>
    %cst_24 = arith.constant 4.000000e+00 : f32
    %78 = vector.broadcast %cst_24 : f32 to vector<3x1xf32>
    %79 = arith.divf %77, %78 : vector<3x1xf32>
    %cst_25 = arith.constant dense<0.000000e+00> : vector<3xf32>
    %80 = vector.multi_reduction <add>, %75, %cst_25 [1] : vector<3x8xf32> to vector<3xf32>
    %81 = vector.shape_cast %80 : vector<3xf32> to vector<3x1xf32>
    %cst_26 = arith.constant 4.000000e+00 : f32
    %82 = vector.broadcast %cst_26 : f32 to vector<3x1xf32>
    %83 = arith.divf %81, %82 : vector<3x1xf32>
    %84 = tpu.iota {dimensions = array<i32: 1>} : vector<1x8xi32>
    %c4_i32_27 = arith.constant 4 : i32
    %85 = vector.broadcast %c4_i32_27 : i32 to vector<1x8xi32>
    %86 = arith.cmpi slt, %84, %85 : vector<1x8xi32>
    %87 = vector.broadcast %79 : vector<3x1xf32> to vector<3x8xf32>
    %88 = arith.subf %70, %87 : vector<3x8xf32>
    %cst_28 = arith.constant 0.000000e+00 : f32
    %89 = vector.shape_cast %86 : vector<1x8xi1> to vector<1x8xi1>
    %90 = vector.broadcast %89 : vector<1x8xi1> to vector<3x8xi1>
    %91 = vector.broadcast %cst_28 : f32 to vector<3x8xf32>
    %92 = arith.select %90, %88, %91 : vector<3x8xi1>, vector<3x8xf32>
    %93 = vector.broadcast %83 : vector<3x1xf32> to vector<3x8xf32>
    %94 = arith.subf %75, %93 : vector<3x8xf32>
    %cst_29 = arith.constant 0.000000e+00 : f32
    %95 = vector.shape_cast %86 : vector<1x8xi1> to vector<1x8xi1>
    %96 = vector.broadcast %95 : vector<1x8xi1> to vector<3x8xi1>
    %97 = vector.broadcast %cst_29 : f32 to vector<3x8xf32>
    %98 = arith.select %96, %94, %97 : vector<3x8xi1>, vector<3x8xf32>
    %99 = arith.mulf %92, %92 : vector<3x8xf32>
    %100 = arith.mulf %98, %98 : vector<3x8xf32>
    %101 = arith.addf %99, %100 : vector<3x8xf32>
    %102 = vector.shape_cast %101 : vector<3x8xf32> to vector<1x3x8xf32>
    %cst_30 = arith.constant dense<0.000000e+00> : vector<1xf32>
    %103 = vector.multi_reduction <add>, %102, %cst_30 [1, 2] : vector<1x3x8xf32> to vector<1xf32>
    %104 = vector.shape_cast %103 : vector<1xf32> to vector<1x1x1xf32>
    %105 = vector.extract %104[0, 0, 0] : f32 from vector<1x1x1xf32>
    %106 = arith.addf %65, %105 : f32
    %107 = vector.broadcast %106 : f32 to vector<8x128xf32>
    %c0_31 = arith.constant 0 : index
    %c0_32 = arith.constant 0 : index
    %c0_33 = arith.constant 0 : index
    %108 = vector.load %arg5[%c0_31, %c0_32, %c0_33] : memref<1x8x128xf32, #tpu.memory_space<vmem>>, vector<1x8x128xf32>
    %109 = vector.shape_cast %108 : vector<1x8x128xf32> to vector<8x128xf32>
    %110 = vector.shape_cast %107 : vector<8x128xf32> to vector<1x8x128xf32>
    tpu.vector_store %arg5[%c0_31, %c0_32, %c0_33], %110 {strides = array<i32>} : memref<1x8x128xf32, #tpu.memory_space<vmem>>, vector<1x8x128xf32>,
    return
  }
  func.func @transform_0(%arg0: i32) -> (i32, i32, i32) {
    %c0_i32 = arith.constant 0 : i32
    %c0_i32_0 = arith.constant 0 : i32
    %c0_i32_1 = arith.constant 0 : i32
    return %arg0, %c0_i32, %c0_i32_0 : i32, i32, i32
  }
  func.func @transform_1(%arg0: i32) -> (i32, i32, i32) {
    %c0_i32 = arith.constant 0 : i32
    %c0_i32_0 = arith.constant 0 : i32
    %c0_i32_1 = arith.constant 0 : i32
    return %arg0, %c0_i32, %c0_i32_0 : i32, i32, i32
  }
  func.func @transform_2(%arg0: i32) -> (i32, i32, i32) {
    %c0_i32 = arith.constant 0 : i32
    %c0_i32_0 = arith.constant 0 : i32
    %c0_i32_1 = arith.constant 0 : i32
    %c0_i32_2 = arith.constant 0 : i32
    return %c0_i32, %c0_i32_0, %c0_i32_1 : i32, i32, i32
  }
  func.func @transform_3(%arg0: i32) -> (i32, i32) {
    %c0_i32 = arith.constant 0 : i32
    %c0_i32_0 = arith.constant 0 : i32
    %c0_i32_1 = arith.constant 0 : i32
    return %c0_i32, %c0_i32_0 : i32, i32
  }
  func.func @transform_4(%arg0: i32) -> (i32, i32, i32) {
    %c0_i32 = arith.constant 0 : i32
    %c0_i32_0 = arith.constant 0 : i32
    %c0_i32_1 = arith.constant 0 : i32
    return %arg0, %c0_i32, %c0_i32_0 : i32, i32, i32
  }
}

</mosaic_0001>

<bundles_post_ra>
// kernel: tpu_custom_call.1
= control target key start
LH: loop header
LB: loop body
LE: loop exit
PB: predicated region body
PF: predicated region fallthrough
CT: control target
= control target key end

     0   :  { %9 = vsyncpa [#allocation3], 0  ;;  %s3246_s0 = inlined_call_operand.hbm [shape: f32[6,128,128], index: 0, kind: input, shape index: {}]   ;;  %s3247_s1 = inlined_call_operand.hbm [shape: f32[6,128,128], index: 1, kind: input, shape index: {}]   ;;  %s3248_s2 = inlined_call_operand.vmem [shape: f32[2,128,16], index: 2, kind: input, shape index: {}]   ;;  %s3249_s3 = inlined_call_operand.vmem [shape: f32[16,128], index: 3, kind: input, shape index: {}]   ;;  %s3250_s4 = inlined_call_operand.hbm [shape: f32[2,8,128], index: 4, kind: output, shape index: {}]  }
   0x1   :  { %11 = vsyncpa [#allocation3 + $0x1], 0 }
   0x2   :  { %12 = vsyncpa [#allocation6], 0 }
   0x3   :  { %14 = vsyncpa [#allocation6 + $0x1], 0 }
   0x4   :  { %15 = vsyncpa [#allocation4], 0 }
   0x5   :  { %17 = vsyncpa [#allocation4 + $0x1], 0  ;;  %s2594_s15 = smov 0   ;;  %s2596_s16 = smov 0  }
   0x6   :  { %s2598_s17 = smov 0   ;;  %s2600_s18 = smov 0  }
   0x7 LB: > { %s2615_s19 = sadd.s32 4294967295, %s2559_s18   ;;  %s1610_s20 = sadd.s32 4294967294, %s2559_s18   ;;  %s2559_s18 = sphi %s2600_s18, %s3271_s18   ;;  %s2555_s17 = sphi %s2598_s17, %s3270_s17   ;;  %s2551_s16 = sphi %s2596_s16, %s3269_s16   ;;  %s2547_s15 = sphi %s2594_s15, %s3268_s15  }
   0x8   : > { %s2619_s21 = sadd.s32 1, %s2559_s18   ;;  %s30_s22 = sadd.s32 1, %s2555_s17 }
   0x9   : > { %s27_s23 = ssub.s32 %s2559_s18, %s2619_s21  ;;  %p37_p0 = scmp.ne.s32.totalorder %s2555_s17, %s2551_s16 }
   0xa   : > { %p28_p1 = scmp.eq.s32.totalorder %s27_s23, 0  ;;  %p38_p2 = scmp.eq.s32.totalorder %s2559_s18, 0 }
   0xb   : > { %p43_p3 = scmp.ne.s32.totalorder %s2551_s16, %s2547_s15  ;;  %p44_p4 = scmp.eq.s32.totalorder %s2615_s19, 0 }
   0xc   : > { %s2631_s24 = scalar_select %p28_p1, %s2555_s17, %s30_s22  }
   0xd   : > { %p39_p5 = por %p38_p2, %p37_p0  ;;  %p2633_p6 = por %p44_p4, %p43_p3 }
   0xe   : > { %p135_p7 = scmp.eq.s32.totalorder %s2615_s19, 1  ;;  %p141_p8 = scmp.eq.s32.totalorder %s1610_s20, 1 }
   0xf   : > { %s3253_s25 = scalar_select %p2633_p6, 1, 0 }
  0x10   : > { %p2388_p10 = scmp.lt.s32.totalorder %s2559_s18, 2  ;;  %p2640_p11 = por %p135_p7, %p37_p0 }
  0x11   : > { %p2644_p12 = por %p141_p8, %p43_p3  ;;  %s2649_s28 = sand.u32 1, %s2555_s17  }
  0x12   : > { %s3254_s26 = scalar_select %p2640_p11, 1, 0 }
  0x13   : > { %s3255_s27 = scalar_select %p2644_p12, 1, 0 }
  0x14   : > { %s1643_s29 = smul.u32 6144, %s2559_s18  ;;  %p2660_p13 = pnand %p2388_p10, %p39_p5 }
  0x15   : > { %s2364_s30 = smul.u32 384, %s2649_s28  ;;  %s168_s11 = scalar_lea.sflag [#allocation3], %s2649_s28 }
  0x16   : > { %s2658_s7 = scalar_lea.hbm %s3246_s0, %s1643_s29  ;;  %p2431_p1 = pneg %p2660_p13 }
  0x17   : > { %s171_s9 = scalar_lea.vmem [#allocation2], %s2364_s30  ;;  %s2429_s12 = scalar_lea.hbm %s2658_s7, 6144 }
  0x18   : > { %s179_s10 = sshll.u32 %s171_s9, 4  ;;  %p2430_p0 = scmp.ne.s32.totalorder %s2658_s7, %s2429_s12  ;;  %s2666_s10 = int_to_ptr.vmem [resolvable:$true] %s179_s10 }
  0x19   : > { %s2434_s20 = scalar_lea.hbm %s3246_s0, 12288  ;;  %p2435_p4 = scmp.lt.u32.totalorder %s2658_s7, %s3246_s0 }
  0x1a   : > { %p2432_p2 = pnand %p2431_p1, %p2430_p0  ;;  %p2436_p5 = scmp.lt.u32.totalorder %s2434_s20, %s2429_s12 }
  0x1b   : > { %p2438_p8 = scmp.lt.u32.totalorder %s2429_s12, %s2658_s7 }
  0x1c   : > { %p2433_p3 = pneg %p2432_p2  ;;  %p2437_p7 = por %p2436_p5, %p2435_p4 }
  0x1e   : > { %p2439_p10 = por %p2438_p8, %p2437_p7 }
  0x20   : > { %p2440_p9 = pnand %p2439_p10, %p2433_p3 }
  0x22   : > { %2443 = shalt.err (!%p2440_p9)
}
  0x23   : > { %s2444_s5 = scalar_lea.vmem %s2666_s10, 6144  ;;  %s2561_s6 = smov [#allocation2]  }
  0x24   : > { %p2445_p0 = scmp.ne.s32.totalorder %s2666_s10, %s2444_s5  ;;  %s2449_s9 = sshll.u32 %s2561_s6, 4  ;;  %s2450_s9 = int_to_ptr.vmem [resolvable:$false] %s2449_s9 }
  0x25   : > { %s2451_s13 = scalar_lea.vmem %s2450_s9, 12288  ;;  %p2452_p11 = scmp.lt.s32.totalorder %s2666_s10, %s2450_s9 }
  0x26   : > { %p2447_p2 = pnand %p2445_p0, %p2431_p1  ;;  %p2453_p4 = scmp.lt.s32.totalorder %s2451_s13, %s2444_s5 }
  0x28   : > { %p2448_p12 = pneg %p2447_p2  ;;  %p2454_p5 = por %p2453_p4, %p2452_p11 }
  0x2a   : > { %p2455_p7 = pnand %p2454_p5, %p2448_p12 }
  0x2c   : > { %2458 = shalt.err (!%p2455_p7)
}
  0x2d   : > { %s2562_s12 = smov 128   ;;  %s2563_s14 = smov 8  }
  0x2e   : > { %2380 = dma.hbm_to_vmem [thread:$0]  (!%p2660_p13), %s2658_s7, 6144, %s2666_s10, %s168_s11, %s2562_s12, %s2562_s12, %s2563_s14  }
  0x2f   : > { %p1617_p9 = scmp.ge.s32.totalorder %s2559_s18, 1  ;;  %p209_p11 = scmp.lt.s32.totalorder %s2559_s18, 3 }
  0x30   : > { %s2710_s5 = scalar_lea.hbm %s3247_s1, %s1643_s29  ;;  %s193_s6 = scalar_lea.vmem [#allocation5], %s2364_s30 }
  0x31   : > { %p2701_p12 = pnand %p1617_p9, %p209_p11  ;;  %s201_s9 = sshll.u32 %s193_s6, 4  ;;  %s2714_s9 = int_to_ptr.vmem [resolvable:$true] %s201_s9 }
  0x32   : > { %s190_s7 = scalar_lea.sflag [#allocation6], %s2649_s28  ;;  %s2459_s10 = scalar_lea.hbm %s2710_s5, 6144 }
  0x33   : > { %p2460_p3 = scmp.ne.s32.totalorder %s2710_s5, %s2459_s10  ;;  %s2464_s29 = scalar_lea.hbm %s3247_s1, 12288 }
  0x34   : > { %p2465_p0 = scmp.lt.u32.totalorder %s2710_s5, %s3247_s1  ;;  %p2466_p2 = scmp.lt.u32.totalorder %s2464_s29, %s2459_s10 }
  0x35   : > { %p2462_p8 = pnand %p2460_p3, %p2431_p1  ;;  %p2468_p5 = scmp.lt.u32.totalorder %s2459_s10, %s2710_s5 }
  0x36   : > { %p2467_p4 = por %p2466_p2, %p2465_p0 }
  0x37   : > { %p2463_p10 = pneg %p2462_p8 }
  0x38   : > { %p2469_p7 = por %p2468_p5, %p2467_p4 }
  0x3a   : > { %p2470_p9 = pnand %p2469_p7, %p2463_p10 }
  0x3c   : > { %2473 = shalt.err (!%p2470_p9)
}
  0x3d   : > { %s2474_s30 = scalar_lea.vmem %s2714_s9, 6144  ;;  %s2564_s6 = smov [#allocation5]  }
  0x3e   : > { %p2475_p11 = scmp.ne.s32.totalorder %s2714_s9, %s2474_s30  ;;  %s2479_s11 = sshll.u32 %s2564_s6, 4  ;;  %s2480_s11 = int_to_ptr.vmem [resolvable:$false] %s2479_s11 }
  0x3f   : > { %s2481_s13 = scalar_lea.vmem %s2480_s11, 12288  ;;  %p2482_p6 = scmp.lt.s32.totalorder %s2714_s9, %s2480_s11 }
  0x40   : > { %p2477_p3 = pnand %p2475_p11, %p2431_p1  ;;  %p2483_p0 = scmp.lt.s32.totalorder %s2481_s13, %s2474_s30 }
  0x42   : > { %p2478_p8 = pneg %p2477_p3  ;;  %p2484_p2 = por %p2483_p0, %p2482_p6 }
  0x44   : > { %p2485_p4 = pnand %p2484_p2, %p2478_p8 }
  0x46   : > { %2488 = shalt.err (!%p2485_p4)
}
  0x47   : > { %2383 = dma.hbm_to_vmem [thread:$0]  (!%p2660_p13), %s2710_s5, 6144, %s2714_s9, %s190_s7, %s2562_s12, %s2562_s12, %s2563_s14  }
  0x48   : > { %213 = sbr.rel (%p2701_p12) target bundleno = 1578 (0x62a), region = 36  ;;  %s2748_s10 = sand.u32 (!%p2701_p12), 1, %s2551_s16  }
  0x49   : > { %s2366_s29 = smul.u32 (!%p2701_p12), 384, %s2748_s10  ;;  %s216_s22 = scalar_lea.sflag (!%p2701_p12), [#allocation3], %s2748_s10 }
  0x4a   : > { %p3258_p6 = scmp.ne.s32.totalorder (!%p2701_p12), %s3253_s25, 0 }
  0x4b   : > { %s2752_s8 = scalar_lea.vmem (!%p2701_p12), [#allocation2], %s2366_s29 }
  0x4f   : > { %2534 = dma.done.wait (%p3258_p6), %s216_s22, 6144  }
  0x50   : > { %2536 = vsyncadd (%p3258_p6), %s216_s22, 4294961152  ;;  %s225_s28 = scalar_lea.sflag [#allocation6], %s2748_s10  ;;  %s2759_s12 = scalar_lea.vmem [#allocation5], %s2366_s29 }
  0x51   : > { %2538 = dma.done.wait (%p3258_p6), %s225_s28, 6144  }
  0x52   : > { %2540 = vsyncadd (%p3258_p6), %s225_s28, 4294961152  ;;  %v1619_v0 = vld [vmem:[%s3248_s2 + $0x80] sm:$0xff]  ;;  %v1620_v1 = vld [vmem:[%s3248_s2 + $0x88] sm:$0xff]  ;;  %s2565_s13 = smov 8   ;;  %s2566_s29 = smov 120   ;;  %vm1290_vm5 = vcmask 64512  }
  0x53   : > { %v1621_v2 = vld [vmem:[%s3248_s2 + $0x90] sm:$0xff]  ;;  %v2140_v3 = vpack.c.bf16 %v1620_v1, %v1619_v0  ;;  %v1622_v4 = vld [vmem:[%s3248_s2 + $0x98] sm:$0xff]  ;;  %v1623_v6 = vld [vmem:[%s3248_s2 + $0xa0] sm:$0xff]  ;;  %vm1358_vm6 = vcmask 1041409   ;;  %vm1360_vm7 = vcmask 1042434   ;;  %vm1363_vm8 = vcmask 59392  }
  0x54   : > { %v2144_v5 = vpack.c.bf16 %v1622_v4, %v1621_v2  ;;  %v1624_v7 = vld [vmem:[%s3248_s2 + $0xa8] sm:$0xff]  ;;  %v308_v9 = vld [vmem:[%s2759_s12] sm:$0xff]  ;;  %v1625_v10 = vld [vmem:[%s3248_s2 + $0xb0] sm:$0xff]  ;;  %s1618_s22 = sshll.u32 %s2748_s10, 3  ;;  %s1636_s28 = sshll.u32 %s2615_s19, 7 }
  0x55   : > { %2141 = vmatprep.subr.bf16.mxu0 %v2140_v3  ;;  %2300 = vmatprep.subr.bf16.mxu1 %v2140_v3  ;;  %v2148_v8 = vpack.c.bf16 %v1624_v7, %v1623_v6  ;;  %v1626_v11 = vld [vmem:[%s3248_s2 + $0xb8] sm:$0xff]  ;;  %v1627_v13 = vld [vmem:[%s3248_s2 + $0xc0] sm:$0xff]  ;;  %v1628_v14 = vld [vmem:[%s3248_s2 + $0xc8] sm:$0xff]  ;;  %s257_s20 = scalar_lea.vmem [#allocation7], %s1618_s22  ;;  %s3202_s6 = scalar_lea.hbm %s3250_s4, %s1636_s28 }
  0x56   : > { %2143 = vmatpush3.bf16.msra.mxu0 %v2140_v3  ;;  %2308 = vmatpush3.bf16.msra.mxu1 %v2140_v3  ;;  %v2152_v12 = vpack.c.bf16 %v1626_v11, %v1625_v10  ;;  %v2156_v15 = vpack.c.bf16 %v1628_v14, %v1627_v13  ;;  %v1629_v16 = vld [vmem:[%s3248_s2 + $0xd0] sm:$0xff]  ;;  %v1630_v17 = vld [vmem:[%s3248_s2 + $0xd8] sm:$0xff]  ;;  %v1631_v19 = vld [vmem:[%s3248_s2 + $0xe0] sm:$0xff]  ;;  %s1517_s5 = sshll.u32 %s257_s20, 4  ;;  %p3265_p1 = scmp.ne.s32.totalorder %s3254_s26, 0  ;;  %s3204_s5 = int_to_ptr.vmem [resolvable:$true] %s1517_s5 }
  0x57   : > { %2145 = vmatprep.subr.bf16.mxu0 %v2144_v5  ;;  %2301 = vmatprep.subr.bf16.mxu1 %v2144_v5  ;;  %v2160_v18 = vpack.c.bf16 %v1630_v17, %v1629_v16  ;;  %v1632_v20 = vld [vmem:[%s3248_s2 + $0xe8] sm:$0xff]  ;;  %v324_v22 = vld [vmem:[%s2759_s12 + $0x80] sm:$0xff]  ;;  %v1633_v23 = vld [vmem:[%s3248_s2 + $0xf0] sm:$0xff]  ;;  %s2489_s25 = scalar_lea.vmem %s3204_s5, 128  ;;  %s2568_s19 = smov [#allocation7]  }
  0x58   : > { %1859 = vmatprep.mubr.f32.mxu0 %v308_v9  ;;  %v2164_v21 = vpack.c.bf16 %v1632_v20, %v1631_v19  ;;  %v1634_v24 = vld [vmem:[%s3248_s2 + $0xf8] sm:$0xff]  ;;  %1883 = vmatprep.mubr.f32.mxu1 %v324_v22  ;;  %v356_v26 = vld [vmem:[%s3248_s2] sm:$0xff]  ;;  %v357_v27 = vld [vmem:[%s3248_s2 + $0x8] sm:$0xff]  ;;  %p2490_p13 = scmp.ne.s32.totalorder %s3204_s5, %s2489_s25 }
  0x59   : > { %v2168_v25 = vpack.c.bf16 %v1634_v24, %v1633_v23  ;;  %v2172_v28 = vpack.c.bf16 %v357_v27, %v356_v26  ;;  %v358_v29 = vld [vmem:[%s3248_s2 + $0x10] sm:$0xff]  ;;  %v359_v30 = vld [vmem:[%s3248_s2 + $0x18] sm:$0xff]  ;;  %v309_v31 = vld [vmem:[%s2759_s12 + $0x8] sm:$0xff] }
  0x5a   : > { %2147 = vmatpush3.bf16.msra.mxu0 %v2144_v5  ;;  %2309 = vmatpush3.bf16.msra.mxu1 %v2144_v5  ;;  %v325_v32 = vld [vmem:[%s2759_s12 + $0x88] sm:$0xff]  ;;  %v310_v33 = vld [vmem:[%s2759_s12 + $0x10] sm:$0xff]  ;;  %v2176_v34 = vpack.c.bf16 %v359_v30, %v358_v29  ;;  %v360_v35 = vld [vmem:[%s3248_s2 + $0x20] sm:$0xff]  ;;  %p2491_p12 = pnand %p2490_p13, %p3265_p1 }
  0x5b   : > { %2149 = vmatprep.subr.bf16.mxu0 %v2148_v8  ;;  %2302 = vmatprep.subr.bf16.mxu1 %v2148_v8  ;;  %v361_v36 = vld [vmem:[%s3248_s2 + $0x28] sm:$0xff]  ;;  %v326_v37 = vld [vmem:[%s2759_s12 + $0x90] sm:$0xff]  ;;  %v311_v38 = vld [vmem:[%s2759_s12 + $0x18] sm:$0xff] }
  0x5c   : > { %v327_v39 = vld [vmem:[%s2759_s12 + $0x98] sm:$0xff]  ;;  %v312_v40 = vld [vmem:[%s2759_s12 + $0x20] sm:$0xff]  ;;  %v2180_v41 = vpack.c.bf16 %v361_v36, %v360_v35  ;;  %v362_v42 = vld [vmem:[%s3248_s2 + $0x30] sm:$0xff]  ;;  %p2492_p10 = pneg %p2491_p12 }
  0x5d   : > { %v363_v43 = vld [vmem:[%s3248_s2 + $0x38] sm:$0xff]  ;;  %v328_v44 = vld [vmem:[%s2759_s12 + $0xa0] sm:$0xff]  ;;  %v313_v45 = vld [vmem:[%s2759_s12 + $0x28] sm:$0xff] }
  0x5e   : > { %2151 = vmatpush3.bf16.msra.mxu0 %v2148_v8  ;;  %2310 = vmatpush3.bf16.msra.mxu1 %v2148_v8  ;;  %v329_v46 = vld [vmem:[%s2759_s12 + $0xa8] sm:$0xff]  ;;  %v314_v47 = vld [vmem:[%s2759_s12 + $0x30] sm:$0xff]  ;;  %v2184_v48 = vpack.c.bf16 %v363_v43, %v362_v42  ;;  %v364_v49 = vld [vmem:[%s3248_s2 + $0x40] sm:$0xff] }
  0x5f   : > { %2153 = vmatprep.subr.bf16.mxu0 %v2152_v12  ;;  %2303 = vmatprep.subr.bf16.mxu1 %v2152_v12  ;;  %v365_v50 = vld [vmem:[%s3248_s2 + $0x48] sm:$0xff]  ;;  %v330_v51 = vld [vmem:[%s2759_s12 + $0xb0] sm:$0xff]  ;;  %v315_v52 = vld [vmem:[%s2759_s12 + $0x38] sm:$0xff] }
  0x60   : > { %v331_v53 = vld [vmem:[%s2759_s12 + $0xb8] sm:$0xff]  ;;  %v316_v54 = vld [vmem:[%s2759_s12 + $0x40] sm:$0xff]  ;;  %v2188_v55 = vpack.c.bf16 %v365_v50, %v364_v49  ;;  %v366_v56 = vld [vmem:[%s3248_s2 + $0x50] sm:$0xff] }
  0x61   : > { %v367_v57 = vld [vmem:[%s3248_s2 + $0x58] sm:$0xff]  ;;  %v332_v58 = vld [vmem:[%s2759_s12 + $0xc0] sm:$0xff]  ;;  %v317_v59 = vld [vmem:[%s2759_s12 + $0x48] sm:$0xff] }
  0x62   : > { %2155 = vmatpush3.bf16.msra.mxu0 %v2152_v12  ;;  %2311 = vmatpush3.bf16.msra.mxu1 %v2152_v12  ;;  %v333_v60 = vld [vmem:[%s2759_s12 + $0xc8] sm:$0xff]  ;;  %v318_v61 = vld [vmem:[%s2759_s12 + $0x50] sm:$0xff]  ;;  %v2192_v62 = vpack.c.bf16 %v367_v57, %v366_v56  ;;  %v368_v63 = vld [vmem:[%s3248_s2 + $0x60] sm:$0xff] }
  0x63   : > { %2157 = vmatprep.subr.bf16.mxu0 %v2156_v15  ;;  %2304 = vmatprep.subr.bf16.mxu1 %v2156_v15  ;;  %v369_v0 = vld [vmem:[%s3248_s2 + $0x68] sm:$0xff]  ;;  %v334_v1 = vld [vmem:[%s2759_s12 + $0xd0] sm:$0xff]  ;;  %v319_v2 = vld [vmem:[%s2759_s12 + $0x58] sm:$0xff] }
  0x64   : > { %v335_v3 = vld [vmem:[%s2759_s12 + $0xd8] sm:$0xff]  ;;  %v320_v4 = vld [vmem:[%s2759_s12 + $0x60] sm:$0xff]  ;;  %v2196_v5 = vpack.c.bf16 %v369_v0, %v368_v63  ;;  %v370_v6 = vld [vmem:[%s3248_s2 + $0x70] sm:$0xff] }
  0x65   : > { %v371_v7 = vld [vmem:[%s3248_s2 + $0x78] sm:$0xff]  ;;  %v336_v8 = vld [vmem:[%s2759_s12 + $0xe0] sm:$0xff]  ;;  %v321_v9 = vld [vmem:[%s2759_s12 + $0x68] sm:$0xff] }
  0x66   : > { %2159 = vmatpush3.bf16.msra.mxu0 %v2156_v15  ;;  %2312 = vmatpush3.bf16.msra.mxu1 %v2156_v15  ;;  %v337_v10 = vld [vmem:[%s2759_s12 + $0xe8] sm:$0xff]  ;;  %v322_v11 = vld [vmem:[%s2759_s12 + $0x70] sm:$0xff]  ;;  %v2200_v12 = vpack.c.bf16 %v371_v7, %v370_v6  ;;  %v323_v14 = vld [vmem:[%s2759_s12 + $0x78] sm:$0xff] }
  0x67   : > { %2161 = vmatprep.subr.bf16.mxu0 %v2160_v18  ;;  %2305 = vmatprep.subr.bf16.mxu1 %v2160_v18  ;;  %v338_v13 = vld [vmem:[%s2759_s12 + $0xf0] sm:$0xff]  ;;  %v339_v15 = vld [vmem:[%s2759_s12 + $0xf8] sm:$0xff]  ;;  %v260_v16 = vld [vmem:[%s2752_s8] sm:$0xff] }
  0x68   : > { %v340_v17 = vld [vmem:[%s2759_s12 + $0x100] sm:$0xff]  ;;  %v341_v19 = vld [vmem:[%s2759_s12 + $0x108] sm:$0xff]  ;;  %v262_v20 = vld [vmem:[%s2752_s8 + $0x10] sm:$0xff] }
  0x69   : > { %v263_v22 = vld [vmem:[%s2752_s8 + $0x18] sm:$0xff]  ;;  %v264_v24 = vld [vmem:[%s2752_s8 + $0x20] sm:$0xff]  ;;  %v265_v26 = vld [vmem:[%s2752_s8 + $0x28] sm:$0xff] }
  0x6a   : > { %2163 = vmatpush3.bf16.msra.mxu0 %v2160_v18  ;;  %2313 = vmatpush3.bf16.msra.mxu1 %v2160_v18  ;;  %v261_v18 = vld [vmem:[%s2752_s8 + $0x8] sm:$0xff]  ;;  %v343_v23 = vld [vmem:[%s2759_s12 + $0x118] sm:$0xff]  ;;  %v346_v29 = vld [vmem:[%s2759_s12 + $0x130] sm:$0xff] }
  0x6b   : > { %2165 = vmatprep.subr.bf16.mxu0 %v2164_v21  ;;  %2306 = vmatprep.subr.bf16.mxu1 %v2164_v21  ;;  %v345_v27 = vld [vmem:[%s2759_s12 + $0x128] sm:$0xff]  ;;  %v267_v30 = vld [vmem:[%s2752_s8 + $0x38] sm:$0xff]  ;;  %v270_v36 = vld [vmem:[%s2752_s8 + $0x50] sm:$0xff] }
  0x6c   : > { %v349_v35 = vld [vmem:[%s2759_s12 + $0x148] sm:$0xff]  ;;  %v278_v50 = vld [vmem:[%s2752_s8 + $0x90] sm:$0xff]  ;;  %v284_v56 = vld [vmem:[%s2752_s8 + $0xc0] sm:$0xff] }
  0x6d   : > { %v273_v42 = vld [vmem:[%s2752_s8 + $0x68] sm:$0xff]  ;;  %v291_v63 = vld [vmem:[%s2752_s8 + $0xf8] sm:$0xff]  ;;  %v292_v0 = vld [vmem:[%s2752_s8 + $0x100] sm:$0xff] }
  0x6e   : > { %2167 = vmatpush3.bf16.msra.mxu0 %v2164_v21  ;;  %2314 = vmatpush3.bf16.msra.mxu1 %v2164_v21  ;;  %v342_v21 = vld [vmem:[%s2759_s12 + $0x110] sm:$0xff]  ;;  %v353_v43 = vld [vmem:[%s2759_s12 + $0x168] sm:$0xff]  ;;  %v299_v7 = vld [vmem:[%s2752_s8 + $0x138] sm:$0xff] }
  0x6f   : > { %2169 = vmatprep.subr.bf16.mxu0 %v2168_v25  ;;  %2307 = vmatprep.subr.bf16.mxu1 %v2168_v25  ;;  %v277_v49 = vld [vmem:[%s2752_s8 + $0x88] sm:$0xff]  ;;  %v298_v6 = vld [vmem:[%s2752_s8 + $0x130] sm:$0xff] }
  0x70   : > { %v285_v57 = vld [vmem:[%s2752_s8 + $0xc8] sm:$0xff] }
  0x72   : > { %2171 = vmatpush3.bf16.msra.mxu0 %v2168_v25  ;;  %2315 = vmatpush3.bf16.msra.mxu1 %v2168_v25  ;;  %v344_v25 = vld [vmem:[%s2759_s12 + $0x120] sm:$0xff] }
  0x73   : > { %2173 = vmatprep.subr.bf16.mxu0 %v2172_v28 }
  0x75   : > { %1860 = vmatmul.mubr.f32.vlgmr.msra.gmra.mrb[0].mxu0 %v309_v31  ;;  %1884 = vmatmul.mubr.f32.vlgmr.msra.gmra.mrb[0].mxu1 %v325_v32  ;;  %v347_v31 = vld [vmem:[%s2759_s12 + $0x138] sm:$0xff]  ;;  %v268_v32 = vld [vmem:[%s2752_s8 + $0x40] sm:$0xff] }
  0x76   : > { %2175 = vmatpush3.bf16.msra.mxu0 %v2172_v28  ;;  %1862 = vmatprep.mubr.f32.mxu0 %v310_v33  ;;  %v266_v28 = vld [vmem:[%s2752_s8 + $0x30] sm:$0xff]  ;;  %v348_v33 = vld [vmem:[%s2759_s12 + $0x140] sm:$0xff] }
  0x77   : > { %2177 = vmatprep.subr.bf16.mxu0 %v2176_v34  ;;  %1886 = vmatprep.mubr.f32.mxu1 %v326_v37  ;;  %v350_v37 = vld [vmem:[%s2759_s12 + $0x150] sm:$0xff] }
  0x79   : > { %1863 = vmatmul.mubr.f32.gmra.mrb[2].mxu0 %v311_v38  ;;  %1887 = vmatmul.mubr.f32.gmra.mrb[2].mxu1 %v327_v39  ;;  %v271_v38 = vld [vmem:[%s2752_s8 + $0x58] sm:$0xff] }
  0x7a   : > { %2179 = vmatpush3.bf16.msra.mxu0 %v2176_v34  ;;  %1865 = vmatprep.mubr.f32.mxu0 %v312_v40  ;;  %v269_v34 = vld [vmem:[%s2752_s8 + $0x48] sm:$0xff]  ;;  %v351_v39 = vld [vmem:[%s2759_s12 + $0x158] sm:$0xff]  ;;  %v272_v40 = vld [vmem:[%s2752_s8 + $0x60] sm:$0xff] }
  0x7b   : > { %2181 = vmatprep.subr.bf16.mxu0 %v2180_v41  ;;  %1889 = vmatprep.mubr.f32.mxu1 %v328_v44  ;;  %v274_v44 = vld [vmem:[%s2752_s8 + $0x70] sm:$0xff] }
  0x7d   : > { %1866 = vmatmul.mubr.f32.gmra.mrb[4].mxu0 %v313_v45  ;;  %1890 = vmatmul.mubr.f32.gmra.mrb[4].mxu1 %v329_v46  ;;  %v354_v45 = vld [vmem:[%s2759_s12 + $0x170] sm:$0xff]  ;;  %v275_v46 = vld [vmem:[%s2752_s8 + $0x78] sm:$0xff] }
  0x7e   : > { %2183 = vmatpush3.bf16.msra.mxu0 %v2180_v41  ;;  %1868 = vmatprep.mubr.f32.mxu0 %v314_v47  ;;  %v352_v41 = vld [vmem:[%s2759_s12 + $0x160] sm:$0xff]  ;;  %v355_v47 = vld [vmem:[%s2759_s12 + $0x178] sm:$0xff]  ;;  %s1504_s12 = scalar_lea.sflag [#allocation4], %s2748_s10 }
  0x7f   : > { %2185 = vmatprep.subr.bf16.mxu0 %v2184_v48  ;;  %1892 = vmatprep.mubr.f32.mxu1 %v330_v51  ;;  %v279_v51 = vld [vmem:[%s2752_s8 + $0x98] sm:$0xff] }
  0x81   : > { %1869 = vmatmul.mubr.f32.gmra.mrb[6].mxu0 %v315_v52  ;;  %1893 = vmatmul.mubr.f32.gmra.mrb[6].mxu1 %v331_v53  ;;  %v280_v52 = vld [vmem:[%s2752_s8 + $0xa0] sm:$0xff]  ;;  %v281_v53 = vld [vmem:[%s2752_s8 + $0xa8] sm:$0xff] }
  0x82   : > { %2187 = vmatpush3.bf16.msra.mxu0 %v2184_v48  ;;  %1871 = vmatprep.mubr.f32.mxu0 %v316_v54  ;;  %v276_v48 = vld [vmem:[%s2752_s8 + $0x80] sm:$0xff]  ;;  %v282_v54 = vld [vmem:[%s2752_s8 + $0xb0] sm:$0xff] }
  0x83   : > { %2189 = vmatprep.subr.bf16.mxu0 %v2188_v55  ;;  %1895 = vmatprep.mubr.f32.mxu1 %v332_v58  ;;  %v286_v58 = vld [vmem:[%s2752_s8 + $0xd0] sm:$0xff] }
  0x85   : > { %1872 = vmatmul.mubr.f32.gmra.mrb[8].mxu0 %v317_v59  ;;  %1896 = vmatmul.mubr.f32.gmra.mrb[8].mxu1 %v333_v60  ;;  %v287_v59 = vld [vmem:[%s2752_s8 + $0xd8] sm:$0xff]  ;;  %v288_v60 = vld [vmem:[%s2752_s8 + $0xe0] sm:$0xff] }
  0x86   : > { %2191 = vmatpush3.bf16.msra.mxu0 %v2188_v55  ;;  %1874 = vmatprep.mubr.f32.mxu0 %v318_v61  ;;  %v283_v55 = vld [vmem:[%s2752_s8 + $0xb8] sm:$0xff]  ;;  %v289_v61 = vld [vmem:[%s2752_s8 + $0xe8] sm:$0xff] }
  0x87   : > { %2193 = vmatprep.subr.bf16.mxu0 %v2192_v62  ;;  %1898 = vmatprep.mubr.f32.mxu1 %v334_v1  ;;  %v293_v1 = vld [vmem:[%s2752_s8 + $0x108] sm:$0xff] }
  0x89   : > { %1875 = vmatmul.mubr.f32.gmra.mrb[10].mxu0 %v319_v2  ;;  %1899 = vmatmul.mubr.f32.gmra.mrb[10].mxu1 %v335_v3  ;;  %v294_v2 = vld [vmem:[%s2752_s8 + $0x110] sm:$0xff]  ;;  %v295_v3 = vld [vmem:[%s2752_s8 + $0x118] sm:$0xff] }
  0x8a   : > { %2195 = vmatpush3.bf16.msra.mxu0 %v2192_v62  ;;  %1877 = vmatprep.mubr.f32.mxu0 %v320_v4  ;;  %v290_v62 = vld [vmem:[%s2752_s8 + $0xf0] sm:$0xff]  ;;  %v296_v4 = vld [vmem:[%s2752_s8 + $0x120] sm:$0xff] }
  0x8b   : > { %2197 = vmatprep.subr.bf16.mxu0 %v2196_v5  ;;  %1901 = vmatprep.mubr.f32.mxu1 %v336_v8  ;;  %v300_v8 = vld [vmem:[%s2752_s8 + $0x140] sm:$0xff] }
  0x8d   : > { %1878 = vmatmul.mubr.f32.gmra.mrb[12].mxu0 %v321_v9  ;;  %1902 = vmatmul.mubr.f32.gmra.mrb[12].mxu1 %v337_v10  ;;  %v301_v9 = vld [vmem:[%s2752_s8 + $0x148] sm:$0xff]  ;;  %v302_v10 = vld [vmem:[%s2752_s8 + $0x150] sm:$0xff] }
  0x8e   : > { %2199 = vmatpush3.bf16.msra.mxu0 %v2196_v5  ;;  %1880 = vmatprep.mubr.f32.mxu0 %v322_v11  ;;  %v297_v5 = vld [vmem:[%s2752_s8 + $0x128] sm:$0xff]  ;;  %v303_v11 = vld [vmem:[%s2752_s8 + $0x158] sm:$0xff] }
  0x8f   : > { %2201 = vmatprep.subr.bf16.mxu0 %v2200_v12  ;;  %1904 = vmatprep.mubr.f32.mxu1 %v338_v13  ;;  %v305_v13 = vld [vmem:[%s2752_s8 + $0x168] sm:$0xff] }
  0x91   : > { %1881 = vmatmul.mubr.f32.gmra.mrb[14].mxu0 %v323_v14  ;;  %1905 = vmatmul.mubr.f32.gmra.mrb[14].mxu1 %v339_v15  ;;  %v306_v14 = vld [vmem:[%s2752_s8 + $0x170] sm:$0xff]  ;;  %v307_v15 = vld [vmem:[%s2752_s8 + $0x178] sm:$0xff] }
  0x92   : > { %2203 = vmatpush3.bf16.msra.mxu0 %v2200_v12  ;;  %1963 = vmatprep.mubr.f32.mxu0 %v260_v16  ;;  %v304_v12 = vld [vmem:[%s2752_s8 + $0x160] sm:$0xff]  ;;  %s2493_s8 = sshll.u32 %s2568_s19, 4  ;;  %s2494_s8 = int_to_ptr.vmem [resolvable:$false] %s2493_s8 }
  0x93   : > { %1907 = vmatprep.mubr.f32.mxu1 %v340_v17  ;;  %v2960_v16 = vld [vmem:[%s3249_s3] sm:$0xff]  ;;  %s2495_s11 = scalar_lea.vmem %s2494_s8, 256  ;;  %p2496_p5 = scmp.lt.s32.totalorder %s3204_s5, %s2494_s8 }
  0x94   : > { %p2497_p7 = scmp.lt.s32.totalorder %s2495_s11, %s2489_s25 }
  0x95   : > { %1964 = vmatmul.mubr.f32.vlgmr.msra.gmra.mrb[0].mxu0 %v261_v18  ;;  %1908 = vmatmul.mubr.f32.gmra.mrb[16].mxu1 %v341_v19 }
  0x96   : > { %1966 = vmatprep.mubr.f32.mxu0 %v262_v20  ;;  %1910 = vmatprep.mubr.f32.mxu1 %v342_v21  ;;  %p2498_p9 = por %p2497_p7, %p2496_p5 }
  0x98   : > { %p2499_p11 = pnand %p2498_p9, %p2492_p10 }
  0x99   : > { %1967 = vmatmul.mubr.f32.gmra.mrb[2].mxu0 %v263_v22  ;;  %1911 = vmatmul.mubr.f32.gmra.mrb[18].mxu1 %v343_v23 }
  0x9a   : > { %1969 = vmatprep.mubr.f32.mxu0 %v264_v24  ;;  %1913 = vmatprep.mubr.f32.mxu1 %v344_v25 }
  0x9d   : > { %1970 = vmatmul.mubr.f32.gmra.mrb[4].mxu0 %v265_v26  ;;  %1914 = vmatmul.mubr.f32.gmra.mrb[20].mxu1 %v345_v27 }
  0x9e   : > { %1972 = vmatprep.mubr.f32.mxu0 %v266_v28  ;;  %1916 = vmatprep.mubr.f32.mxu1 %v346_v29 }
  0xa1   : > { %1973 = vmatmul.mubr.f32.gmra.mrb[6].mxu0 %v267_v30  ;;  %1917 = vmatmul.mubr.f32.gmra.mrb[22].mxu1 %v347_v31 }
  0xa2   : > { %1975 = vmatprep.mubr.f32.mxu0 %v268_v32  ;;  %1919 = vmatprep.mubr.f32.mxu1 %v348_v33 }
  0xa5   : > { %1976 = vmatmul.mubr.f32.gmra.mrb[8].mxu0 %v269_v34  ;;  %1920 = vmatmul.mubr.f32.gmra.mrb[24].mxu1 %v349_v35 }
  0xa6   : > { %1978 = vmatprep.mubr.f32.mxu0 %v270_v36  ;;  %1922 = vmatprep.mubr.f32.mxu1 %v350_v37 }
  0xa9   : > { %1979 = vmatmul.mubr.f32.gmra.mrb[10].mxu0 %v271_v38  ;;  %1923 = vmatmul.mubr.f32.gmra.mrb[26].mxu1 %v351_v39 }
  0xaa   : > { %1981 = vmatprep.mubr.f32.mxu0 %v272_v40  ;;  %1925 = vmatprep.mubr.f32.mxu1 %v352_v41 }
  0xad   : > { %1982 = vmatmul.mubr.f32.gmra.mrb[12].mxu0 %v273_v42  ;;  %1926 = vmatmul.mubr.f32.gmra.mrb[28].mxu1 %v353_v43 }
  0xae   : > { %1984 = vmatprep.mubr.f32.mxu0 %v274_v44  ;;  %1928 = vmatprep.mubr.f32.mxu1 %v354_v45 }
  0xb1   : > { %1985 = vmatmul.mubr.f32.gmra.mrb[14].mxu0 %v275_v46  ;;  %1929 = vmatmul.mubr.f32.gmra.mrb[30].mxu1 %v355_v47 }
  0xb2   : > { %1987 = vmatprep.mubr.f32.mxu0 %v276_v48  ;;  %2067 = vmatprep.mubr.f32.mxu1 %v2960_v16 }
  0xb5   : > { %1988 = vmatmul.mubr.f32.gmra.mrb[16].mxu0 %v277_v49 }
  0xb6   : > { %1990 = vmatprep.mubr.f32.mxu0 %v278_v50 }
  0xb9   : > { %1991 = vmatmul.mubr.f32.gmra.mrb[18].mxu0 %v279_v51 }
  0xba   : > { %1993 = vmatprep.mubr.f32.mxu0 %v280_v52 }
  0xbd   : > { %1994 = vmatmul.mubr.f32.gmra.mrb[20].mxu0 %v281_v53 }
  0xbe   : > { %1996 = vmatprep.mubr.f32.mxu0 %v282_v54 }
  0xc1   : > { %1997 = vmatmul.mubr.f32.gmra.mrb[22].mxu0 %v283_v55 }
  0xc2   : > { %1999 = vmatprep.mubr.f32.mxu0 %v284_v56 }
  0xc5   : > { %2000 = vmatmul.mubr.f32.gmra.mrb[24].mxu0 %v285_v57 }
  0xc6   : > { %2002 = vmatprep.mubr.f32.mxu0 %v286_v58 }
  0xc9   : > { %2003 = vmatmul.mubr.f32.gmra.mrb[26].mxu0 %v287_v59 }
  0xca   : > { %2005 = vmatprep.mubr.f32.mxu0 %v288_v60 }
  0xcd   : > { %2006 = vmatmul.mubr.f32.gmra.mrb[28].mxu0 %v289_v61 }
  0xce   : > { %2008 = vmatprep.mubr.f32.mxu0 %v290_v62 }
  0xd1   : > { %2009 = vmatmul.mubr.f32.gmra.mrb[30].mxu0 %v291_v63 }
  0xd2   : > { %2011 = vmatprep.mubr.f32.mxu0 %v292_v0 }
  0xd5   : > { %2012 = vmatmul.mubr.f32.gmra.mrb[32].mxu0 %v293_v1 }
  0xd6   : > { %2014 = vmatprep.mubr.f32.mxu0 %v294_v2 }
  0xd9   : > { %2015 = vmatmul.mubr.f32.gmra.mrb[34].mxu0 %v295_v3 }
  0xda   : > { %2017 = vmatprep.mubr.f32.mxu0 %v296_v4 }
  0xdd   : > { %2018 = vmatmul.mubr.f32.gmra.mrb[36].mxu0 %v297_v5 }
  0xde   : > { %2020 = vmatprep.mubr.f32.mxu0 %v298_v6 }
  0xe1   : > { %2021 = vmatmul.mubr.f32.gmra.mrb[38].mxu0 %v299_v7 }
  0xe2   : > { %2023 = vmatprep.mubr.f32.mxu0 %v300_v8 }
  0xe5   : > { %2024 = vmatmul.mubr.f32.gmra.mrb[40].mxu0 %v301_v9 }
  0xe6   : > { %2026 = vmatprep.mubr.f32.mxu0 %v302_v10 }
  0xe9   : > { %2027 = vmatmul.mubr.f32.gmra.mrb[42].mxu0 %v303_v11 }
  0xea   : > { %2029 = vmatprep.mubr.f32.mxu0 %v304_v12  ;;  %v3031_v12 = vld [vmem:[%s3249_s3 + $0x8] sm:$0xff] }
  0xed   : > { %2030 = vmatmul.mubr.f32.gmra.mrb[44].mxu0 %v305_v13 }
  0xee   : > { %2032 = vmatprep.mubr.f32.mxu0 %v306_v14 }
  0xf1   : > { %2033 = vmatmul.mubr.f32.gmra.mrb[46].mxu0 %v307_v15 }
 0x148   : > { %v2963_v17 = vpop.f32.mrb[0].mxu1 }
 0x149   : > { %v2965_v18 = vpop.f32.mrb[1].mxu1 }
 0x14c   : > { %v2967_v19 = vpop.f32.mrb[2].mxu1 }
 0x14d   : > { %v2969_v20 = vpop.f32.mrb[3].mxu1 }
 0x150   : > { %v2971_v21 = vpop.f32.mrb[4].mxu1 }
 0x151   : > { %v2973_v22 = vpop.f32.mrb[5].mxu1 }
 0x154   : > { %v2975_v23 = vpop.f32.mrb[6].mxu1 }
 0x155   : > { %v2977_v24 = vpop.f32.mrb[7].mxu1 }
 0x158   : > { %v2979_v25 = vpop.f32.mrb[8].mxu1 }
 0x159   : > { %v2981_v26 = vpop.f32.mrb[9].mxu1 }
 0x15c   : > { %v2983_v27 = vpop.f32.mrb[10].mxu1 }
 0x15d   : > { %v2985_v28 = vpop.f32.mrb[11].mxu1 }
 0x160   : > { %v2987_v29 = vpop.f32.mrb[12].mxu1 }
 0x161   : > { %v2989_v30 = vpop.f32.mrb[13].mxu1 }
 0x164   : > { %v2991_v31 = vpop.f32.mrb[14].mxu1 }
 0x165   : > { %v2993_v32 = vpop.f32.mrb[15].mxu1 }
 0x168   : > { %v1965_v33 = vpop.f32.mrb[0].mxu0  ;;  %v2995_v34 = vpop.f32.mrb[16].mxu1 }
 0x169   : > { %v760_v35 = vpop.f32.mrb[1].mxu0  ;;  %v2997_v36 = vpop.f32.mrb[17].mxu1 }
 0x16a   : > { %v2204_v37 = vpack.c.bf16 %v1965_v33, %v760_v35 }
 0x16c   : > { %v1968_v38 = vpop.f32.mrb[2].mxu0  ;;  %2205 = vmatprep.subr.bf16.mxu1 %v2204_v37  ;;  %v2999_v39 = vpop.f32.mrb[18].mxu1 }
 0x16d   : > { %v770_v40 = vpop.f32.mrb[3].mxu0  ;;  %2207 = vmatpush3.bf16.msra.mxu1 %v2204_v37  ;;  %v3001_v41 = vpop.f32.mrb[19].mxu1 }
 0x16e   : > { %v2208_v42 = vpack.c.bf16 %v1968_v38, %v770_v40 }
 0x170   : > { %v1971_v43 = vpop.f32.mrb[4].mxu0  ;;  %2209 = vmatprep.subr.bf16.mxu1 %v2208_v42  ;;  %v3003_v44 = vpop.f32.mrb[20].mxu1 }
 0x171   : > { %v780_v45 = vpop.f32.mrb[5].mxu0  ;;  %2211 = vmatpush3.bf16.msra.mxu1 %v2208_v42  ;;  %v3005_v46 = vpop.f32.mrb[21].mxu1 }
 0x172   : > { %v2212_v47 = vpack.c.bf16 %v1971_v43, %v780_v45 }
 0x174   : > { %v1974_v48 = vpop.f32.mrb[6].mxu0  ;;  %2213 = vmatprep.subr.bf16.mxu1 %v2212_v47  ;;  %v3007_v49 = vpop.f32.mrb[22].mxu1 }
 0x175   : > { %v790_v50 = vpop.f32.mrb[7].mxu0  ;;  %2215 = vmatpush3.bf16.msra.mxu1 %v2212_v47  ;;  %v3009_v51 = vpop.f32.mrb[23].mxu1 }
 0x176   : > { %v2216_v52 = vpack.c.bf16 %v1974_v48, %v790_v50 }
 0x178   : > { %v1977_v53 = vpop.f32.mrb[8].mxu0  ;;  %2217 = vmatprep.subr.bf16.mxu1 %v2216_v52  ;;  %v3011_v54 = vpop.f32.mrb[24].mxu1 }
 0x179   : > { %v800_v55 = vpop.f32.mrb[9].mxu0  ;;  %2219 = vmatpush3.bf16.msra.mxu1 %v2216_v52  ;;  %v3013_v56 = vpop.f32.mrb[25].mxu1 }
 0x17a   : > { %v2220_v57 = vpack.c.bf16 %v1977_v53, %v800_v55 }
 0x17c   : > { %v1980_v58 = vpop.f32.mrb[10].mxu0  ;;  %2221 = vmatprep.subr.bf16.mxu1 %v2220_v57  ;;  %v3015_v59 = vpop.f32.mrb[26].mxu1 }
 0x17d   : > { %v810_v60 = vpop.f32.mrb[11].mxu0  ;;  %2223 = vmatpush3.bf16.msra.mxu1 %v2220_v57  ;;  %v3017_v61 = vpop.f32.mrb[27].mxu1 }
 0x17e   : > { %v2224_v62 = vpack.c.bf16 %v1980_v58, %v810_v60 }
 0x180   : > { %v1983_v63 = vpop.f32.mrb[12].mxu0  ;;  %2225 = vmatprep.subr.bf16.mxu1 %v2224_v62  ;;  %v3019_v0 = vpop.f32.mrb[28].mxu1 }
 0x181   : > { %v820_v1 = vpop.f32.mrb[13].mxu0  ;;  %2227 = vmatpush3.bf16.msra.mxu1 %v2224_v62  ;;  %v3021_v2 = vpop.f32.mrb[29].mxu1 }
 0x182   : > { %v2228_v3 = vpack.c.bf16 %v1983_v63, %v820_v1 }
 0x184   : > { %v1986_v4 = vpop.f32.mrb[14].mxu0  ;;  %2229 = vmatprep.subr.bf16.mxu1 %v2228_v3  ;;  %v3023_v5 = vpop.f32.mrb[30].mxu1 }
 0x185   : > { %v830_v6 = vpop.f32.mrb[15].mxu0  ;;  %2231 = vmatpush3.bf16.msra.mxu1 %v2228_v3  ;;  %v3025_v7 = vpop.f32.mrb[31].mxu1 }
 0x186   : > { %v2232_v8 = vpack.c.bf16 %v1986_v4, %v830_v6 }
 0x188   : > { %v1989_v9 = vpop.f32.mrb[16].mxu0  ;;  %2233 = vmatprep.subr.bf16.mxu1 %v2232_v8 }
 0x189   : > { %v846_v10 = vadd.f32 %v1989_v9, %v2963_v17  ;;  %v840_v11 = vpop.f32.mrb[17].mxu0  ;;  %2235 = vmatpush3.bf16.msra.mxu1 %v2232_v8 }
 0x18a   : > { %v841_v13 = vadd.f32 %v840_v11, %v2965_v18 }
 0x18c   : > { %v2236_v14 = vpack.c.bf16 %v846_v10, %v841_v13  ;;  %v1992_v15 = vpop.f32.mrb[18].mxu0  ;;  %2068 = vmatmul.mubr.f32.vlgmr.msra.gmra.mrb[32].mxu1 %v3031_v12 }
 0x18d   : > { %v856_v33 = vadd.f32 %v1992_v15, %v2967_v19  ;;  %v850_v35 = vpop.f32.mrb[19].mxu0  ;;  %2102 = vmatprep.mubr.f32.mxu1 %v2960_v16 }
 0x18e   : > { %v851_v17 = vadd.f32 %v850_v35, %v2969_v20  ;;  %2237 = vmatprep.subr.bf16.mxu1 %v2236_v14 }
 0x18f   : > { %2239 = vmatpush3.bf16.msra.mxu1 %v2236_v14 }
 0x190   : > { %v2240_v37 = vpack.c.bf16 %v856_v33, %v851_v17  ;;  %v1995_v38 = vpop.f32.mrb[20].mxu0 }
 0x191   : > { %v866_v40 = vadd.f32 %v1995_v38, %v2971_v21  ;;  %v860_v42 = vpop.f32.mrb[21].mxu0 }
 0x192   : > { %v861_v18 = vadd.f32 %v860_v42, %v2973_v22  ;;  %2241 = vmatprep.subr.bf16.mxu1 %v2240_v37 }
 0x193   : > { %2243 = vmatpush3.bf16.msra.mxu1 %v2240_v37 }
 0x194   : > { %v2244_v43 = vpack.c.bf16 %v866_v40, %v861_v18  ;;  %v1998_v45 = vpop.f32.mrb[22].mxu0 }
 0x195   : > { %v876_v19 = vadd.f32 %v1998_v45, %v2975_v23  ;;  %v870_v47 = vpop.f32.mrb[23].mxu0 }
 0x196   : > { %v871_v48 = vadd.f32 %v870_v47, %v2977_v24  ;;  %2245 = vmatprep.subr.bf16.mxu1 %v2244_v43 }
 0x197   : > { %2247 = vmatpush3.bf16.msra.mxu1 %v2244_v43 }
 0x198   : > { %v2248_v20 = vpack.c.bf16 %v876_v19, %v871_v48  ;;  %v2001_v50 = vpop.f32.mrb[24].mxu0 }
 0x199   : > { %v886_v52 = vadd.f32 %v2001_v50, %v2979_v25  ;;  %v880_v53 = vpop.f32.mrb[25].mxu0 }
 0x19a   : > { %v881_v21 = vadd.f32 %v880_v53, %v2981_v26  ;;  %2249 = vmatprep.subr.bf16.mxu1 %v2248_v20 }
 0x19b   : > { %2251 = vmatpush3.bf16.msra.mxu1 %v2248_v20 }
 0x19c   : > { %v2252_v22 = vpack.c.bf16 %v886_v52, %v881_v21  ;;  %v2004_v55 = vpop.f32.mrb[26].mxu0 }
 0x19d   : > { %v896_v57 = vadd.f32 %v2004_v55, %v2983_v27  ;;  %v890_v58 = vpop.f32.mrb[27].mxu0 }
 0x19e   : > { %v891_v23 = vadd.f32 %v890_v58, %v2985_v28  ;;  %2253 = vmatprep.subr.bf16.mxu1 %v2252_v22 }
 0x19f   : > { %2255 = vmatpush3.bf16.msra.mxu1 %v2252_v22 }
 0x1a0   : > { %v2256_v24 = vpack.c.bf16 %v896_v57, %v891_v23  ;;  %v2007_v60 = vpop.f32.mrb[28].mxu0  ;;  %v1253_v57 = vlaneseq }
 0x1a1   : > { %v906_v62 = vadd.f32 %v2007_v60, %v2987_v29  ;;  %v900_v63 = vpop.f32.mrb[29].mxu0 }
 0x1a2   : > { %v901_v25 = vadd.f32 %v900_v63, %v2989_v30  ;;  %2257 = vmatprep.subr.bf16.mxu1 %v2256_v24  ;;  %v3080_v58 = vshrl.u32 %v1253_v57, 7  ;;  %v3082_v23 = vand.u32 127, %v1253_v57 }
 0x1a3   : > { %2259 = vmatpush3.bf16.msra.mxu1 %v2256_v24 }
 0x1a4   : > { %v2260_v26 = vpack.c.bf16 %v906_v62, %v901_v25  ;;  %v2010_v1 = vpop.f32.mrb[30].mxu0  ;;  %vm1257_vm0 = vcmp.lt.s32.totalorder %v3080_v58, 4  ;;  %vm1258_vm1 = vcmp.lt.s32.totalorder %v3082_v23, 4  ;;  %vm1262_vm3 = vcmp.eq.s32.totalorder %v3080_v58, %v3082_v23 }
 0x1a5   : > { %v916_v3 = vadd.f32 %v2010_v1, %v2991_v31  ;;  %v910_v4 = vpop.f32.mrb[31].mxu0  ;;  %vm3092_vm2 = vmand %vm1257_vm0, %vm1258_vm1  ;;  %vm1260_vm9 = vcmp.gt.s32.totalorder %v3082_v23, %v3080_v58 }
 0x1a6   : > { %v911_v27 = vadd.f32 %v910_v4, %v2993_v32  ;;  %2261 = vmatprep.subr.bf16.mxu1 %v2260_v26  ;;  %vm3102_vm4 = vmand %vm1262_vm3, %vm3092_vm2 }
 0x1a7   : > { %2263 = vmatpush3.bf16.msra.mxu1 %v2260_v26  ;;  %vm3179_vm10 = vmand %vm1260_vm9, %vm3092_vm2 }
 0x1a8   : > { %v2264_v28 = vpack.c.bf16 %v916_v3, %v911_v27  ;;  %v2013_v6 = vpop.f32.mrb[32].mxu0 }
 0x1a9   : > { %v926_v8 = vadd.f32 %v2013_v6, %v2995_v34  ;;  %v920_v9 = vpop.f32.mrb[33].mxu0 }
 0x1aa   : > { %v921_v29 = vadd.f32 %v920_v9, %v2997_v36  ;;  %2265 = vmatprep.subr.bf16.mxu1 %v2264_v28 }
 0x1ab   : > { %2267 = vmatpush3.bf16.msra.mxu1 %v2264_v28 }
 0x1ac   : > { %v2268_v30 = vpack.c.bf16 %v926_v8, %v921_v29  ;;  %v2016_v10 = vpop.f32.mrb[34].mxu0 }
 0x1ad   : > { %v936_v11 = vadd.f32 %v2016_v10, %v2999_v39  ;;  %v930_v13 = vpop.f32.mrb[35].mxu0 }
 0x1ae   : > { %v931_v31 = vadd.f32 %v930_v13, %v3001_v41  ;;  %2103 = vmatmul.mubr.f32.vlgmr.msra.gmra.mrb[34].mxu1 %v3031_v12  ;;  %2269 = vmatprep.subr.bf16.mxu1 %v2268_v30 }
 0x1af   : > { %2271 = vmatpush3.bf16.msra.mxu1 %v2268_v30  ;;  %2137 = vmatprep.mubr.f32.mxu1 %v2960_v16 }
 0x1b0   : > { %v2272_v32 = vpack.c.bf16 %v936_v11, %v931_v31  ;;  %v2019_v34 = vpop.f32.mrb[36].mxu0 }
 0x1b1   : > { %v946_v14 = vadd.f32 %v2019_v34, %v3003_v44  ;;  %v940_v36 = vpop.f32.mrb[37].mxu0 }
 0x1b2   : > { %v941_v15 = vadd.f32 %v940_v36, %v3005_v46  ;;  %2273 = vmatprep.subr.bf16.mxu1 %v2272_v32 }
 0x1b3   : > { %2275 = vmatpush3.bf16.msra.mxu1 %v2272_v32 }
 0x1b4   : > { %v2276_v33 = vpack.c.bf16 %v946_v14, %v941_v15  ;;  %v2022_v39 = vpop.f32.mrb[38].mxu0 }
 0x1b5   : > { %v956_v35 = vadd.f32 %v2022_v39, %v3007_v49  ;;  %v950_v41 = vpop.f32.mrb[39].mxu0  ;;  %v3133_v39 = vsub.s32 %v3082_v23, %v3080_v58 }
 0x1b6   : > { %v951_v17 = vadd.f32 %v950_v41, %v3009_v51  ;;  %2277 = vmatprep.subr.bf16.mxu1 %v2276_v33 }
 0x1b7   : > { %2279 = vmatpush3.bf16.msra.mxu1 %v2276_v33 }
 0x1b8   : > { %v2280_v37 = vpack.c.bf16 %v956_v35, %v951_v17  ;;  %v2025_v16 = vpop.f32.mrb[40].mxu0 }
 0x1b9   : > { %v966_v38 = vadd.f32 %v2025_v16, %v3011_v54  ;;  %v960_v40 = vpop.f32.mrb[41].mxu0 }
 0x1ba   : > { %v961_v44 = vadd.f32 %v960_v40, %v3013_v56  ;;  %2281 = vmatprep.subr.bf16.mxu1 %v2280_v37 }
 0x1bb   : > { %2283 = vmatpush3.bf16.msra.mxu1 %v2280_v37 }
 0x1bc   : > { %v2284_v46 = vpack.c.bf16 %v966_v38, %v961_v44  ;;  %v2028_v42 = vpop.f32.mrb[42].mxu0 }
 0x1bd   : > { %v976_v18 = vadd.f32 %v2028_v42, %v3015_v59  ;;  %v970_v43 = vpop.f32.mrb[43].mxu0  ;;  %v2567_v42 = vmov 0  }
 0x1be   : > { %v971_v49 = vadd.f32 %v970_v43, %v3017_v61  ;;  %2285 = vmatprep.subr.bf16.mxu1 %v2284_v46  ;;  %2428 = vset.pattern.permute.xlu1 %v2567_v42 }
 0x1bf   : > { %2287 = vmatpush3.bf16.msra.mxu1 %v2284_v46  ;;  %2427 = vset.pattern.permute.xlu0 %v2567_v42 }
 0x1c0   : > { %v2288_v51 = vpack.c.bf16 %v976_v18, %v971_v49  ;;  %v2031_v45 = vpop.f32.mrb[44].mxu0 }
 0x1c1   : > { %v986_v19 = vadd.f32 %v2031_v45, %v3019_v0  ;;  %v980_v47 = vpop.f32.mrb[45].mxu0 }
 0x1c2   : > { %v981_v54 = vadd.f32 %v980_v47, %v3021_v2  ;;  %2289 = vmatprep.subr.bf16.mxu1 %v2288_v51 }
 0x1c3   : > { %2291 = vmatpush3.bf16.msra.mxu1 %v2288_v51 }
 0x1c4   : > { %v2292_v56 = vpack.c.bf16 %v986_v19, %v981_v54  ;;  %v2034_v48 = vpop.f32.mrb[46].mxu0 }
 0x1c5   : > { %v996_v20 = vadd.f32 %v2034_v48, %v3023_v5  ;;  %v990_v50 = vpop.f32.mrb[47].mxu0  ;;  %v1398_v48 = vsub.s32 1, %v3080_v58 }
 0x1c6   : > { %v991_v59 = vadd.f32 %v990_v50, %v3025_v7  ;;  %2293 = vmatprep.subr.bf16.mxu1 %v2292_v56  ;;  %v1402_v50 = vsub.s32 2, %v3080_v58 }
 0x1c7   : > { %2295 = vmatpush3.bf16.msra.mxu1 %v2292_v56  ;;  %v1394_v56 = vsub.s32 0, %v3080_v58 }
 0x1c8   : > { %v2296_v61 = vpack.c.bf16 %v996_v20, %v991_v59 }
 0x1ca   : > { %2297 = vmatprep.subr.bf16.mxu1 %v2296_v61 }
 0x1cb   : > { %2299 = vmatpush3.bf16.msra.mxu1 %v2296_v61 }
 0x1ce   : > { %2138 = vmatmul.mubr.f32.vlgmr.msra.gmra.mrb[36].mxu1 %v3031_v12 }
 0x25f   : > { %v2069_v0 = vpop.f32.mrb[32].mxu1 }
 0x260   : > { %1081 = vrot.lane.b32.xlu0 %v2069_v0, %s2565_s13  ;;  %v1067_v2 = vpop.f32.mrb[33].mxu1 }
 0x281   : > { %v2104_v52 = vpop.f32.mrb[34].mxu1 }
 0x282   : > { %1165 = vrot.lane.b32.xlu0 %v2104_v52, %s2565_s13  ;;  %v1151_v53 = vpop.f32.mrb[35].mxu1 }
 0x286   : > { %1161 = vrot.lane.b32.xlu0 %v2104_v52, %s2566_s29 }
 0x2a1   : > { %v2139_v5 = vpop.f32.mrb[36].mxu1 }
 0x2a2   : > { %1249 = vrot.lane.b32.xlu1 %v2139_v5, %s2565_s13  ;;  %v1235_v7 = vpop.f32.mrb[37].mxu1 }
 0x2a6   : > { %1077 = vrot.lane.b32.xlu1 %v2069_v0, %s2566_s29 }
 0x2aa   : > { %1245 = vrot.lane.b32.xlu1 %v2139_v5, %s2566_s29 }
 0x2d2   : > { %v1082_v21 = vpop.permute.xlu0 %1081 }
 0x2d3   : > { %v3072_v22 = vsub.f32 %v1067_v2, %v1082_v21 }
 0x2d5   : > { %1322 = vrot.lane.b32.xlu0 %v3072_v22, %s2566_s29 }
 0x2f4   : > { %v1166_v12 = vpop.permute.xlu0 %1165 }
 0x2f5   : > { %v3076_v55 = vsub.f32 %v1151_v53, %v1166_v12 }
 0x2f7   : > { %1324 = vrot.lane.b32.xlu1 %v3076_v55, %s2566_s29 }
 0x2f8   : > { %v1162_v4 = vpop.permute.xlu0 %1161 }
 0x2f9   : > { %v3110_v27 = vadd.f32 %v1162_v4, %v1151_v53  ;;  %v1268_v4 = vmul.f32 %v3076_v55, %v3076_v55 }
 0x2fb   : > { %v1308_v28 = vsel %vm3102_vm4, %v3110_v27, 0.0 }
 0x2fc   : > { %v1313_v6 = vsel %vm1290_vm5, %v1308_v28, 0.0 }
 0x314   : > { %v1250_v24 = vpop.permute.xlu1 %1249 }
 0x315   : > { %v3086_v60 = vsub.f32 %v1235_v7, %v1250_v24 }
 0x317   : > { %1326 = vrot.lane.b32.xlu0 %v3086_v60, %s2566_s29  ;;  %v1269_v28 = vmul.f32 %v3086_v60, %v3086_v60 }
 0x318   : > { %v1078_v63 = vpop.permute.xlu1 %1077 }
 0x319   : > { %v3098_v25 = vadd.f32 %v1078_v63, %v1067_v2 }
 0x31b   : > { %v1307_v1 = vsel %vm3102_vm4, %v3098_v25, 0.0 }
 0x31c   : > { %v1310_v3 = vsel %vm1290_vm5, %v1307_v1, 0.0  ;;  %v1246_v8 = vpop.permute.xlu1 %1245 }
 0x31d   : > { %1311 = vadd.xlane.f32.xlu1 %v1310_v3  ;;  %v3116_v9 = vadd.f32 %v1246_v8, %v1235_v7  ;;  %v1267_v3 = vmul.f32 %v3072_v22, %v3072_v22 }
 0x31f   : > { %v1309_v11 = vsel %vm3102_vm4, %v3116_v9, 0.0  ;;  %v1266_v62 = vmul.f32 %v3116_v9, %v3116_v9 }
 0x320   : > { %v1316_v13 = vsel %vm1290_vm5, %v1309_v11, 0.0 }
 0x336   : > { %1314 = vadd.xlane.f32.xlu0 %v1313_v6 }
 0x347   : > { %v1323_v29 = vpop.permute.xlu0 %1322 }
 0x348   : > { %v1331_v30 = vsel %vm3102_vm4, %v1323_v29, 0.0 }
 0x349   : > { %v1334_v10 = vsel %vm1290_vm5, %v1331_v30, 0.0 }
 0x34a   : > { %1335 = vadd.xlane.f32.xlu0 %v1334_v10 }
 0x34e   : > { %1317 = vadd.xlane.f32.xlu0 %v1316_v13 }
 0x369   : > { %v1325_v31 = vpop.permute.xlu1 %1324 }
 0x36a   : > { %v1332_v32 = vsel %vm3102_vm4, %v1325_v31, 0.0 }
 0x36b   : > { %v1337_v34 = vsel %vm1290_vm5, %v1332_v32, 0.0 }
 0x36c   : > { %1338 = vadd.xlane.f32.xlu1 %v1337_v34 }
 0x389   : > { %v1327_v14 = vpop.permute.xlu0 %1326 }
 0x38a   : > { %v1333_v36 = vsel %vm3102_vm4, %v1327_v14, 0.0 }
 0x38b   : > { %v1340_v15 = vsel %vm1290_vm5, %v1333_v36, 0.0 }
 0x38c   : > { %1341 = vadd.xlane.f32.xlu1 %v1340_v15 }
 0x3aa   : > { %v1312_v41 = vpop.xlane.xlu1 %1311 }
 0x3ab   : > { %v1349_v37 = vrot.slane %v1312_v41, %v3133_v39 }
 0x3c3   : > { %v1315_v33 = vpop.xlane.xlu0 %1314 }
 0x3c4   : > { %v1353_v17 = vrot.slane %v1315_v33, %v3133_v39 }
 0x3c6   : > { %v1359_v40 = vsel %vm1358_vm6, %v1353_v17, %v1349_v37 }
 0x3d7   : > { %v1336_v35 = vpop.xlane.xlu0 %1335 }
 0x3d8   : > { %v1375_v49 = vrot.slane %v1336_v35, %v3133_v39 }
 0x3db   : > { %v1318_v16 = vpop.xlane.xlu0 %1317 }
 0x3dc   : > { %v1357_v38 = vrot.slane %v1318_v16, %v3133_v39 }
 0x3de   : > { %v1361_v44 = vsel %vm1360_vm7, %v1357_v38, %v1359_v40  ;;  %v1265_v40 = vmul.f32 %v3110_v27, %v3110_v27 }
 0x3df   : > { %v1364_v46 = vsel %vm1363_vm8, %v1361_v44, 0.0 }
 0x3e0   : > { %1365 = vadd.xlane.f32.xlu0 %v1364_v46 }
 0x3f9   : > { %v1339_v18 = vpop.xlane.xlu1 %1338 }
 0x3fa   : > { %v1379_v43 = vrot.slane %v1339_v18, %v3133_v39 }
 0x3fc   : > { %v1384_v19 = vsel %vm1358_vm6, %v1379_v43, %v1375_v49 }
 0x419   : > { %v1342_v51 = vpop.xlane.xlu1 %1341 }
 0x41a   : > { %v1383_v45 = vrot.slane %v1342_v51, %v3133_v39 }
 0x41c   : > { %v1385_v47 = vsel %vm1360_vm7, %v1383_v45, %v1384_v19 }
 0x41d   : > { %v1387_v54 = vsel %vm1363_vm8, %v1385_v47, 0.0 }
 0x41e   : > { %1388 = vadd.xlane.f32.xlu1 %v1387_v54 }
 0x46d   : > { %v1366_v20 = vpop.xlane.xlu0 %1365 }
 0x46e   : > { %v1368_v59 = vmul.f32 0.25, %v1366_v20 }
 0x470   : > { %v1395_v61 = vrot.slane %v1368_v59, %v1394_v56  ;;  %v1399_v0 = vrot.slane %v1368_v59, %v1398_v48  ;;  %v1403_v2 = vrot.slane %v1368_v59, %v1402_v50 }
 0x472   : > { %v1408_v52 = vsub.f32 %v1315_v33, %v1399_v0  ;;  %v1407_v53 = vsub.f32 %v1312_v41, %v1395_v61  ;;  %v1409_v5 = vsub.f32 %v1318_v16, %v1403_v2 }
 0x474   : > { %1419 = vperm.xlu1 %2428, %v1408_v52   ;;  %1416 = vperm.xlu0 %2427, %v1407_v53  }
 0x478   : > { %1422 = vperm.xlu1 %2428, %v1409_v5  }
 0x4ab   : > { %v1389_v7 = vpop.xlane.xlu1 %1388 }
 0x4ac   : > { %v1390_v21 = vmul.f32 0.25, %v1389_v7 }
 0x4ae   : > { %v1444_v12 = vrot.slane %v1390_v21, %v1394_v56  ;;  %v1448_v57 = vrot.slane %v1390_v21, %v1398_v48  ;;  %v1452_v63 = vrot.slane %v1390_v21, %v1402_v50 }
 0x4b0   : > { %v1456_v24 = vsub.f32 %v1336_v35, %v1444_v12  ;;  %v1457_v26 = vsub.f32 %v1339_v18, %v1448_v57  ;;  %v1458_v1 = vsub.f32 %v1342_v51, %v1452_v63  ;;  %v1264_v35 = vmul.f32 %v3098_v25, %v3098_v25 }
 0x4b2   : > { %1463 = vperm.xlu1 %2428, %v1456_v24  }
 0x4b6   : > { %1466 = vperm.xlu1 %2428, %v1457_v26  }
 0x4ba   : > { %1469 = vperm.xlu1 %2428, %v1458_v1  }
 0x4be   : > { %1273 = vrot.lane.b32.xlu1 %v1267_v3, %s2566_s29 }
 0x4c2   : > { %1275 = vrot.lane.b32.xlu1 %v1268_v4, %s2566_s29 }
 0x4c6   : > { %1277 = vrot.lane.b32.xlu1 %v1269_v28, %s2566_s29 }
 0x4f3   : > { %v1420_v6 = vpop.permute.xlu1 %1419  ;;  %v1417_v29 = vpop.permute.xlu0 %1416 }
 0x4f4   : > { %v1431_v10 = vrot.slane %v1420_v6, %v3133_v39  ;;  %v1427_v22 = vrot.slane %v1417_v29, %v3133_v39 }
 0x4f6   : > { %v1436_v55 = vsel %vm1358_vm6, %v1431_v10, %v1427_v22 }
 0x4f7   : > { %v1423_v8 = vpop.permute.xlu1 %1422 }
 0x4f8   : > { %v1435_v11 = vrot.slane %v1423_v8, %v3133_v39 }
 0x4fa   : > { %v1437_v32 = vsel %vm1360_vm7, %v1435_v11, %v1436_v55 }
 0x4fb   : > { %v1439_v15 = vsel %vm1258_vm1, %v1437_v32, 0.0 }
 0x4fc   : > { %v1487_v16 = vmul.f32 %v1439_v15, %v1439_v15 }
 0x531   : > { %v1464_v30 = vpop.permute.xlu1 %1463 }
 0x532   : > { %v1474_v60 = vrot.slane %v1464_v30, %v3133_v39 }
 0x535   : > { %v1467_v13 = vpop.permute.xlu1 %1466 }
 0x536   : > { %v1478_v31 = vrot.slane %v1467_v13, %v3133_v39 }
 0x538   : > { %v1483_v36 = vsel %vm1358_vm6, %v1478_v31, %v1474_v60 }
 0x539   : > { %v1470_v34 = vpop.permute.xlu1 %1469 }
 0x53a   : > { %v1482_v14 = vrot.slane %v1470_v34, %v3133_v39 }
 0x53c   : > { %v1484_v33 = vsel %vm1360_vm7, %v1482_v14, %v1483_v36 }
 0x53d   : > { %v1274_v41 = vpop.permute.xlu1 %1273  ;;  %v1486_v17 = vsel %vm1258_vm1, %v1484_v33, 0.0 }
 0x53e   : > { %v1282_v37 = vadd.f32 %v1274_v41, %v1264_v35  ;;  %v1488_v39 = vmul.f32 %v1486_v17, %v1486_v17 }
 0x540   : > { %v1489_v58 = vadd.f32 %v1488_v39, %v1487_v16  ;;  %v1287_v25 = vsel %vm3179_vm10, %v1282_v37, 0.0 }
 0x541   : > { %v1276_v44 = vpop.permute.xlu1 %1275  ;;  %v1291_v18 = vsel %vm1290_vm5, %v1287_v25, 0.0 }
 0x542   : > { %v1283_v46 = vadd.f32 %v1276_v44, %v1265_v40  ;;  %v1490_v23 = vsel %vm1363_vm8, %v1489_v58, 0.0 }
 0x543   : > { %1491 = vadd.xlane.f32.xlu1 %v1490_v23 }
 0x544   : > { %v1288_v42 = vsel %vm3179_vm10, %v1283_v46, 0.0 }
 0x545   : > { %v1292_v43 = vsel %vm1290_vm5, %v1288_v42, 0.0  ;;  %v1278_v27 = vpop.permute.xlu1 %1277 }
 0x546   : > { %v1284_v49 = vadd.f32 %v1278_v27, %v1266_v62  ;;  %v1293_v51 = vadd.f32 %v1292_v43, %v1291_v18 }
 0x548   : > { %v1289_v45 = vsel %vm3179_vm10, %v1284_v49, 0.0 }
 0x549   : > { %v1294_v19 = vsel %vm1290_vm5, %v1289_v45, 0.0 }
 0x54a   : > { %v1295_v47 = vadd.f32 %v1294_v19, %v1293_v51 }
 0x54c   : > { %1296 = vadd.xlane.f32.xlu0 %v1295_v47 }
 0x5d0   : > { %v1492_v54 = vpop.xlane.xlu1 %1491 }
 0x5d1   : > { %v1493_v56 = vrot.slane %v1492_v54, 4 }
 0x5d3   : > { %v1494_v48 = vadd.f32 %v1493_v56, %v1492_v54 }
 0x5d5   : > { %v1495_v9 = vrot.slane %v1494_v48, 2 }
 0x5d7   : > { %v1496_v61 = vadd.f32 %v1495_v9, %v1494_v48 }
 0x5d9   : > { %v1297_v20 = vpop.xlane.xlu0 %1296  ;;  %v1497_v52 = vrot.slane %v1496_v61, 1 }
 0x5da   : > { %v1298_v50 = vrot.slane %v1297_v20, 4 }
 0x5db   : > { %v1498_v7 = vadd.f32 %v1497_v52, %v1496_v61 }
 0x5dc   : > { %v1299_v59 = vadd.f32 %v1298_v50, %v1297_v20 }
 0x5de   : > { %v1300_v0 = vrot.slane %v1299_v59, 2 }
 0x5e0   : > { %v1301_v2 = vadd.f32 %v1300_v0, %v1299_v59 }
 0x5e2   : > { %v1302_v53 = vrot.slane %v1301_v2, 1 }
 0x5e4   : > { %v1303_v5 = vadd.f32 %v1302_v53, %v1301_v2 }
 0x5e6   : > { %2367 = vpush %v1303_v5 }
 0x5e7   : > { %2369 = vpush %v1498_v7 }
 0x617   : > { %s2368_s14 = spop %2367 }
 0x618   : > { %s2370_s9 = spop %2369 }
 0x619   : > { %s1500_s7 = sadd.f32 %s2370_s9, %s2368_s14 }
 0x61b   : > { %v1501_v21 = vstv %s1500_s7 }
 0x61c   : > { %1502 = vst [vmem:[%s257_s20] sm:$0xff] %v1501_v21 }
 0x61d   : > { %2502 = shalt.err (!%p2499_p11)
}
 0x61e   : > { %s2503_s10 = scalar_lea.hbm %s3202_s6, 128  ;;  %s2507_s22 = scalar_lea.hbm %s3250_s4, 256 }
 0x61f   : > { %p2504_p3 = scmp.ne.s32.totalorder %s3202_s6, %s2503_s10  ;;  %p2508_p2 = scmp.lt.u32.totalorder %s3202_s6, %s3250_s4 }
 0x620   : > { %p2509_p4 = scmp.lt.u32.totalorder %s2507_s22, %s2503_s10  ;;  %p2511_p13 = scmp.lt.u32.totalorder %s2503_s10, %s3202_s6 }
 0x621   : > { %p2505_p8 = pnand %p2504_p3, %p3265_p1 }
 0x622   : > { %p2510_p6 = por %p2509_p4, %p2508_p2 }
 0x623   : > { %p2506_p0 = pneg %p2505_p8 }
 0x624   : > { %p2512_p12 = por %p2511_p13, %p2510_p6 }
 0x626   : > { %p2513_p10 = pnand %p2512_p12, %p2506_p0 }
 0x628   : > { %2516 = shalt.err (!%p2513_p10)
}
 0x629   : > { %2375 = dma.vmem_to_hbm [thread:$0]  (%p3265_p1), %s3204_s5, 128, %s3202_s6, %s1504_s12  }
 0x62a PF: > { %s1529_s20 = sand.u32 1, %s2547_s15   ;;  %p3266_p5 = scmp.ne.s32.totalorder %s3255_s27, 0 }
 0x62b   : > { %p3267_p7 = scmp.ge.s32.totalorder %s2559_s18, 2  ;;  %s1530_s9 = scalar_lea.sflag [#allocation4], %s1529_s20 }
 0x62d   : > { %p2385_p9 = pnand %p3267_p7, %p3266_p5 }
 0x62f   : > { %2542 = dma.done.wait (!%p2385_p9), %s1530_s9, 128  }
 0x630   : > { %2544 = vsyncadd (!%p2385_p9), %s1530_s9, 4294967168  ;;  %p20_p11 = scmp.ge.s32.totalorder %s2619_s21, 4   ;;  %s3268_s15 = smov %s2551_s16 }
 0x631   : > { %s3269_s16 = smov %s2555_s17  ;;  %s3270_s17 = smov %s2631_s24 }
 0x632   : > { %s3271_s18 = smov %s2619_s21  ;;  %22 = sbr.rel (!%p20_p11) target bundleno = 7 (0x7), region = 95 }
 0x639   :  { %1535 = vsyncpa [#allocation3], 1 }
 0x63a   :  { %1537 = vsyncpa [#allocation3 + $0x1], 1 }
 0x63b   :  { %1538 = vsyncpa [#allocation6], 1 }
 0x63c   :  { %1540 = vsyncpa [#allocation6 + $0x1], 1 }
 0x63d   :  { %1541 = vsyncpa [#allocation4], 1 }
 0x63e   :  { %1543 = vsyncpa [#allocation4 + $0x1], 1 }

</bundles_post_ra>
